<compile_context>
chip_gen: v5e
topology: v5e:2x2
jax: 0.10.0
libtpu: 0.0.40
codegen_flags: <defaults>
</compile_context>

<pallas_src>
import functools

import jax
import jax.numpy as jnp
from jax.experimental import pallas as pl
from jax.experimental.pallas import tpu as pltpu


def _round_up(n, m):
    return ((n + m - 1) // m) * m


def _mlp_kernel(x_ref, w1_ref, b1_ref, w2_ref, b2_ref, o_ref):
    # fc1 on the MXU: cast the streamed x tile to bf16 on the VPU (in VMEM), then
    # bf16 x bf16 with an f32 accumulator.
    x_bf = x_ref[...].astype(jnp.bfloat16)
    h = jnp.dot(x_bf, w1_ref[...], preferred_element_type=jnp.float32)
    # Bias + ReLU in f32 on the VPU.
    h = jnp.maximum(h + b1_ref[...], 0.0)
    # TODO(synk): dropout(p=0.5) is identity in eval mode; training-mode masking with
    # pltpu.prng_seed/prng_random_bits (+ 1/(1-p) scale) is not implemented here.
    # fc2 on the MXU: bf16 x bf16 -> f32.
    y = jnp.dot(h.astype(jnp.bfloat16), w2_ref[...], preferred_element_type=jnp.float32)
    o_ref[...] = (y + b2_ref[...]).astype(o_ref.dtype)


def prepare_params(w1, b1, w2, b2):
    """One-time parameter prep, hoisted out of the per-call forward path.

    Weights are stored pre-transposed relative to PyTorch's (out, in) convention:
    w1: (D_in, H), w2: (H, D_out). Hidden/output dims are zero-padded to multiples of
    128 (lane-dense MXU pushes / unmasked output stores); D_in is left unpadded.
    Weights are cast to bf16 once; biases stay f32 for the f32 epilogue.
    """
    d_in, hidden = w1.shape
    d_out = w2.shape[1]
    h_p = _round_up(hidden, 128)
    d_out_p = _round_up(d_out, 128)

    w1p = jnp.pad(w1, ((0, 0), (0, h_p - hidden))).astype(jnp.bfloat16)
    b1p = jnp.pad(b1, (0, h_p - hidden)).astype(jnp.float32).reshape(1, h_p)
    w2p = jnp.pad(w2, ((0, h_p - hidden), (0, d_out_p - d_out))).astype(jnp.bfloat16)
    b2p = jnp.pad(b2, (0, d_out_p - d_out)).astype(jnp.float32).reshape(1, d_out_p)
    return w1p, b1p, w2p, b2p


@functools.partial(jax.jit, static_argnames=("d_out", "tile_b"))
def transformer_forward(x, w1p, b1p, w2p, b2p, *, d_out, tile_b=256):
    """x: (B, D_in) f32; prepped params from prepare_params; returns (B, d_out)."""
    B, d_in = x.shape
    h_p = w1p.shape[1]
    d_out_p = w2p.shape[1]

    # Batch tile: multiple of 8, capped at tile_b (256 fills a v6e/v7x MXU pass and
    # amortizes per-grid-step overhead). For B <= tile_b this is a single grid step.
    tb = min(tile_b, _round_up(B, 8))
    b_p = _round_up(B, tb)

    # Only the batch dim is padded, and only if needed; D_in is streamed as-is.
    xp = x if b_p == B else jnp.pad(x, ((0, b_p - B), (0, 0)))

    flops = 2 * b_p * d_in * h_p + 2 * b_p * h_p * d_out_p
    bytes_accessed = (
        xp.size * xp.dtype.itemsize
        + w1p.size * w1p.dtype.itemsize
        + w2p.size * w2p.dtype.itemsize
        + b1p.size * b1p.dtype.itemsize
        + b2p.size * b2p.dtype.itemsize
        + b_p * d_out_p * x.dtype.itemsize
    )

    out_p = pl.pallas_call(
        _mlp_kernel,
        out_shape=jax.ShapeDtypeStruct((b_p, d_out_p), x.dtype),
        grid=(b_p // tb,),
        in_specs=[
            # x: streamed per batch tile; last dim == full array dim (no 128 pad).
            pl.BlockSpec((tb, d_in), lambda i: (i, 0)),
            # Weights / biases: constant block index -> fetched once, VMEM-resident.
            pl.BlockSpec((d_in, h_p), lambda i: (0, 0)),
            pl.BlockSpec((1, h_p), lambda i: (0, 0)),
            pl.BlockSpec((h_p, d_out_p), lambda i: (0, 0)),
            pl.BlockSpec((1, d_out_p), lambda i: (0, 0)),
        ],
        out_specs=pl.BlockSpec((tb, d_out_p), lambda i: (i, 0)),
        compiler_params=pltpu.CompilerParams(
            # Batch tiles are independent -> v7x megacore can split them.
            dimension_semantics=("parallel",),
        ),
        cost_estimate=pl.CostEstimate(
            flops=flops, transcendentals=0, bytes_accessed=bytes_accessed
        ),
    )(xp, w1p, b1p, w2p, b2p)

    # Strip batch / feature padding.
    return out_p[:B, :d_out]


def init_params(key, input_dim, hidden_dim, output_dim):
    """Deterministic init mirroring nn.Linear's default U(-1/sqrt(fan_in), 1/sqrt(fan_in))."""
    k1, k2, k3, k4 = jax.random.split(key, 4)
    bound1 = 1.0 / jnp.sqrt(input_dim)
    bound2 = 1.0 / jnp.sqrt(hidden_dim)
    w1 = jax.random.uniform(k1, (input_dim, hidden_dim), jnp.float32, -bound1, bound1)
    b1 = jax.random.uniform(k2, (hidden_dim,), jnp.float32, -bound1, bound1)
    w2 = jax.random.uniform(k3, (hidden_dim, output_dim), jnp.float32, -bound2, bound2)
    b2 = jax.random.uniform(k4, (output_dim,), jnp.float32, -bound2, bound2)
    return w1, b1, w2, b2


if __name__ == "__main__":
    # Shapes consistent with the module: hidden_dim=512, output_dim=2, arbitrary
    # input_dim (X_train.shape[1]); batch large enough to exercise the MXU.
    B, input_dim, hidden_dim, output_dim = 256, 48, 512, 2

    key = jax.random.PRNGKey(0)
    kx, kp = jax.random.split(key)
    x = jax.random.normal(kx, (B, input_dim), jnp.float32)
    w1, b1, w2, b2 = init_params(kp, input_dim, hidden_dim, output_dim)

    # One-time param prep (padding + bf16 cast), then the jitted fused forward.
    w1p, b1p, w2p, b2p = prepare_params(w1, b1, w2, b2)
    out = transformer_forward(x, w1p, b1p, w2p, b2p, d_out=output_dim)
    out = jax.block_until_ready(out)

    # Reference with the same bf16 weight / activation rounding the kernel uses.
    x_bf = x.astype(jnp.bfloat16)
    ref_h = jnp.maximum(
        jnp.dot(x_bf, w1.astype(jnp.bfloat16), preferred_element_type=jnp.float32) + b1,
        0.0,
    )
    ref = (
        jnp.dot(
            ref_h.astype(jnp.bfloat16),
            w2.astype(jnp.bfloat16),
            preferred_element_type=jnp.float32,
        )
        + b2
    )

    assert out.shape == (B, output_dim)
    assert jnp.allclose(out, ref, atol=1e-2, rtol=1e-2), float(
        jnp.max(jnp.abs(out - ref))
    )

    # Loose sanity check vs full-f32 math (differences are expected bf16 matmul noise).
    hp = jax.lax.Precision.HIGHEST
    ref_f32 = jnp.dot(jnp.maximum(jnp.dot(x, w1, precision=hp) + b1, 0.0), w2, precision=hp) + b2
    assert jnp.allclose(out, ref_f32, atol=5e-2, rtol=5e-2), float(
        jnp.max(jnp.abs(out - ref_f32))
    )

    print("KERNEL_OK")
</pallas_src>

<mosaic_0001>
module attributes {stable_mosaic.version = 11 : i64} {
  func.func @_mlp_kernel(%arg0: i32, %arg1: memref<256x48xf32, #tpu.memory_space<vmem>>, %arg2: memref<48x512xbf16, #tpu.memory_space<vmem>>, %arg3: memref<1x512xf32, #tpu.memory_space<vmem>>, %arg4: memref<512x128xbf16, #tpu.memory_space<vmem>>, %arg5: memref<1x128xf32, #tpu.memory_space<vmem>>, %arg6: memref<256x128xf32, #tpu.memory_space<vmem>>) attributes {dimension_semantics = [#tpu.dimension_semantics<parallel>], iteration_bounds = array<i64: 1>, scalar_prefetch = 0 : i64, scratch_operands = 0 : i64, tpu.core_type = #tpu.core_type<tc>, window_params = [{transform_indices = @transform_0, window_bounds = array<i64: 256, 48>}, {pipeline_mode = #tpu.pipeline_mode<synchronous>, transform_indices = @transform_1, window_bounds = array<i64: 48, 512>}, {pipeline_mode = #tpu.pipeline_mode<synchronous>, transform_indices = @transform_2, window_bounds = array<i64: 1, 512>}, {pipeline_mode = #tpu.pipeline_mode<synchronous>, transform_indices = @transform_3, window_bounds = array<i64: 512, 128>}, {pipeline_mode = #tpu.pipeline_mode<synchronous>, transform_indices = @transform_4, window_bounds = array<i64: 1, 128>}, {transform_indices = @transform_5, window_bounds = array<i64: 256, 128>}]} {
    %c0 = arith.constant 0 : index
    %c0_0 = arith.constant 0 : index
    %0 = vector.load %arg1[%c0, %c0_0] : memref<256x48xf32, #tpu.memory_space<vmem>>, vector<256x48xf32>
    %1 = arith.truncf %0 : vector<256x48xf32> to vector<256x48xbf16>
    %c0_1 = arith.constant 0 : index
    %c0_2 = arith.constant 0 : index
    %2 = vector.load %arg2[%c0_1, %c0_2] : memref<48x512xbf16, #tpu.memory_space<vmem>>, vector<48x512xbf16>
    %cst = arith.constant dense<0.000000e+00> : vector<256x512xf32>
    %3 = tpu.matmul %1, %2, %cst {dimension_numbers = #tpu.dot_dimension_numbers<[1], [0], [0], [1], [0, 0, 1, 1], [], []>} : vector<256x48xbf16>, vector<48x512xbf16>, vector<256x512xf32> -> vector<256x512xf32>
    %c0_3 = arith.constant 0 : index
    %c0_4 = arith.constant 0 : index
    %4 = vector.load %arg3[%c0_3, %c0_4] : memref<1x512xf32, #tpu.memory_space<vmem>>, vector<1x512xf32>
    %5 = vector.broadcast %4 : vector<1x512xf32> to vector<256x512xf32>
    %6 = arith.addf %3, %5 : vector<256x512xf32>
    %cst_5 = arith.constant 0.000000e+00 : f32
    %7 = vector.broadcast %cst_5 : f32 to vector<256x512xf32>
    %8 = arith.maximumf %6, %7 : vector<256x512xf32>
    %9 = arith.truncf %8 : vector<256x512xf32> to vector<256x512xbf16>
    %c0_6 = arith.constant 0 : index
    %c0_7 = arith.constant 0 : index
    %10 = vector.load %arg4[%c0_6, %c0_7] : memref<512x128xbf16, #tpu.memory_space<vmem>>, vector<512x128xbf16>
    %cst_8 = arith.constant dense<0.000000e+00> : vector<256x128xf32>
    %11 = tpu.matmul %9, %10, %cst_8 {dimension_numbers = #tpu.dot_dimension_numbers<[1], [0], [0], [1], [0, 0, 1, 1], [], []>} : vector<256x512xbf16>, vector<512x128xbf16>, vector<256x128xf32> -> vector<256x128xf32>
    %c0_9 = arith.constant 0 : index
    %c0_10 = arith.constant 0 : index
    %12 = vector.load %arg5[%c0_9, %c0_10] : memref<1x128xf32, #tpu.memory_space<vmem>>, vector<1x128xf32>
    %13 = vector.broadcast %12 : vector<1x128xf32> to vector<256x128xf32>
    %14 = arith.addf %11, %13 : vector<256x128xf32>
    %c0_11 = arith.constant 0 : index
    %c0_12 = arith.constant 0 : index
    %15 = vector.load %arg6[%c0_11, %c0_12] : memref<256x128xf32, #tpu.memory_space<vmem>>, vector<256x128xf32>
    tpu.vector_store %arg6[%c0_11, %c0_12], %14 {strides = array<i32>} : memref<256x128xf32, #tpu.memory_space<vmem>>, vector<256x128xf32>,
    return
  }
  func.func @transform_0(%arg0: i32) -> (i32, i32) {
    %c0_i32 = arith.constant 0 : i32
    %c0_i32_0 = arith.constant 0 : i32
    return %arg0, %c0_i32 : i32, i32
  }
  func.func @transform_1(%arg0: i32) -> (i32, i32) {
    %c0_i32 = arith.constant 0 : i32
    %c0_i32_0 = arith.constant 0 : i32
    %c0_i32_1 = arith.constant 0 : i32
    return %c0_i32, %c0_i32_0 : i32, i32
  }
  func.func @transform_2(%arg0: i32) -> (i32, i32) {
    %c0_i32 = arith.constant 0 : i32
    %c0_i32_0 = arith.constant 0 : i32
    %c0_i32_1 = arith.constant 0 : i32
    return %c0_i32, %c0_i32_0 : i32, i32
  }
  func.func @transform_3(%arg0: i32) -> (i32, i32) {
    %c0_i32 = arith.constant 0 : i32
    %c0_i32_0 = arith.constant 0 : i32
    %c0_i32_1 = arith.constant 0 : i32
    return %c0_i32, %c0_i32_0 : i32, i32
  }
  func.func @transform_4(%arg0: i32) -> (i32, i32) {
    %c0_i32 = arith.constant 0 : i32
    %c0_i32_0 = arith.constant 0 : i32
    %c0_i32_1 = arith.constant 0 : i32
    return %c0_i32, %c0_i32_0 : i32, i32
  }
  func.func @transform_5(%arg0: i32) -> (i32, i32) {
    %c0_i32 = arith.constant 0 : i32
    %c0_i32_0 = arith.constant 0 : i32
    return %arg0, %c0_i32 : i32, i32
  }
}

</mosaic_0001>

<bundles_post_ra>
// kernel: transformer_forward.1
= control target key start
LH: loop header
LB: loop body
LE: loop exit
PB: predicated region body
PF: predicated region fallthrough
CT: control target
= control target key end

     0   :  { %10 = vsyncpa [#allocation3], 0  ;;  %s1727_s21 = smov [#allocation2]   ;;  %s2550_s0 = inlined_call_operand.vmem [shape: f32[256,48], index: 0, kind: input, shape index: {}]   ;;  %s2551_s1 = inlined_call_operand.vmem [shape: bf16[48,512], index: 1, kind: input, shape index: {}]   ;;  %s2552_s2 = inlined_call_operand.hbm [shape: f32[1,512], index: 2, kind: input, shape index: {}]   ;;  %s2553_s3 = inlined_call_operand.vmem [shape: bf16[512,128], index: 3, kind: input, shape index: {}]   ;;  %s2554_s4 = inlined_call_operand.vmem [shape: f32[1,128], index: 4, kind: input, shape index: {}]   ;;  %s2555_s5 = inlined_call_operand.vmem [shape: f32[256,128], index: 5, kind: output, shape index: {}]  }
   0x1   :  { %s20_s20 = sshll.u32 %s2552_s2, 4  ;;  %s22_s22 = sshll.u32 %s1727_s21, 4  ;;  %s21_s20 = int_to_ptr.hbm [resolvable:$true] %s20_s20  ;;  %s23_s22 = int_to_ptr.vmem [resolvable:$true] %s22_s22 }
   0x2   :  { %25 = dma.hbm_to_vmem [thread:$0]  %s21_s20, 64, %s23_s22, [#allocation3]  }
   0x3   :  { %1725 = dma.done.wait [#allocation3], 64  }
   0x4   :  { %1726 = vsyncadd [#allocation3], 4294967232  ;;  %v1449_v0 = vld [vmem:[%s2551_s1 + $0x40] sm:$0xf]  ;;  %v1665_v1 = vld [vmem:[%s2551_s1 + $0x4c] sm:$0xf0] }
   0x5   :  { %v1663_v2 = vld [vmem:[%s2551_s1 + $0x44] sm:$0xf]  ;;  %v1450_v3 = vor.u32 %v1665_v1, %v1449_v0  ;;  %v1451_v4 = vld [vmem:[%s2551_s1 + $0x50] sm:$0xf0]  ;;  %v1457_v5 = vld [vmem:[%s2551_s1 + $0x48] sm:$0xf] }
   0x6   :  { %v1666_v6 = vld [vmem:[%s2551_s1 + $0x54] sm:$0xf0]  ;;  %v1454_v7 = vor.u32 %v1663_v2, %v1451_v4  ;;  %v1664_v9 = vld [vmem:[%s2551_s1 + $0x4c] sm:$0xf]  ;;  %v1459_v10 = vld [vmem:[%s2551_s1 + $0x58] sm:$0xf0] }
   0x7   :  { %v1458_v8 = vor.u32 %v1666_v6, %v1457_v5  ;;  %v1433_v11 = vld [vmem:[%s2551_s1 + $0x20] sm:$0xf]  ;;  %219 = vmatpush.bf16.msra.mxu0 %v1450_v3  ;;  %v1462_v12 = vor.u32 %v1664_v9, %v1459_v10  ;;  %v1661_v13 = vld [vmem:[%s2551_s1 + $0x2c] sm:$0xf0]  ;;  %v1659_v14 = vld [vmem:[%s2551_s1 + $0x24] sm:$0xf] }
   0x8   :  { %v1435_v15 = vld [vmem:[%s2551_s1 + $0x30] sm:$0xf0]  ;;  %308 = vmatpush.bf16.msra.mxu1 %v1454_v7  ;;  %v1434_v16 = vor.u32 %v1661_v13, %v1433_v11  ;;  %v1441_v18 = vld [vmem:[%s2551_s1 + $0x28] sm:$0xf]  ;;  %v1662_v19 = vld [vmem:[%s2551_s1 + $0x34] sm:$0xf0] }
   0x9   :  { %397 = vmatpush.bf16.msra.mxu2 %v1458_v8  ;;  %v1438_v17 = vor.u32 %v1659_v14, %v1435_v15  ;;  %v1660_v20 = vld [vmem:[%s2551_s1 + $0x2c] sm:$0xf]  ;;  %486 = vmatpush.bf16.msra.mxu3 %v1462_v12  ;;  %v1442_v21 = vor.u32 %v1662_v19, %v1441_v18  ;;  %v1443_v22 = vld [vmem:[%s2551_s1 + $0x38] sm:$0xf0]  ;;  %v1417_v23 = vld [vmem:[%s2551_s1] sm:$0xf] }
   0xa   :  { %v1657_v24 = vld [vmem:[%s2551_s1 + $0xc] sm:$0xf0]  ;;  %v1446_v25 = vor.u32 %v1660_v20, %v1443_v22  ;;  %v1655_v26 = vld [vmem:[%s2551_s1 + $0x4] sm:$0xf]  ;;  %v1419_v27 = vld [vmem:[%s2551_s1 + $0x10] sm:$0xf0] }
   0xb   :  { %v1425_v28 = vld [vmem:[%s2551_s1 + $0x8] sm:$0xf]  ;;  %220 = vmatpush.bf16.msra.mxu0 %v1434_v16  ;;  %v1418_v29 = vor.u32 %v1657_v24, %v1417_v23  ;;  %v1658_v30 = vld [vmem:[%s2551_s1 + $0x14] sm:$0xf0]  ;;  %v1656_v31 = vld [vmem:[%s2551_s1 + $0xc] sm:$0xf]  ;;  %v1422_v33 = vor.u32 %v1655_v26, %v1419_v27 }
   0xc   :  { %v1427_v32 = vld [vmem:[%s2551_s1 + $0x18] sm:$0xf0]  ;;  %309 = vmatpush.bf16.msra.mxu1 %v1438_v17  ;;  %v1426_v34 = vor.u32 %v1658_v30, %v1425_v28  ;;  %v35_v35 = vld [vmem:[%s2550_s0] sm:$0xff]  ;;  %v36_v36 = vld [vmem:[%s2550_s0 + $0x8] sm:$0xff]  ;;  %vm165_vm0 = vcmask 392192  }
   0xd   :  { %398 = vmatpush.bf16.msra.mxu2 %v1442_v21  ;;  %487 = vmatpush.bf16.msra.mxu3 %v1446_v25  ;;  %v1430_v37 = vor.u32 %v1656_v31, %v1427_v32  ;;  %v1690_v38 = vld [vmem:[%s2553_s3 + $0xb8] sm:$0xff]  ;;  %v67_v39 = vpack.c.bf16 %v36_v36, %v35_v35  ;;  %v1689_v43 = vld [vmem:[%s2553_s3 + $0xb0] sm:$0xff]  ;;  %v39_v50 = vld [vmem:[%s2550_s0 + $0x20] sm:$0xff] }
   0xe   :  { %v1698_v40 = vld [vmem:[%s2553_s3 + $0xf8] sm:$0xff]  ;;  %v1673_v44 = vld [vmem:[%s2553_s3 + $0x30] sm:$0xff]  ;;  %v40_v51 = vld [vmem:[%s2550_s0 + $0x28] sm:$0xff] }
   0xf   :  { %221 = vmatpush.bf16.msra.mxu0 %v1418_v29  ;;  %v1674_v41 = vld [vmem:[%s2553_s3 + $0x38] sm:$0xff]  ;;  %v1697_v45 = vld [vmem:[%s2553_s3 + $0xf0] sm:$0xff]  ;;  %v69_v52 = vpack.c.bf16 %v40_v51, %v39_v50  ;;  %v1688_v53 = vld [vmem:[%s2553_s3 + $0xa8] sm:$0xff] }
  0x10   :  { %310 = vmatpush.bf16.msra.mxu1 %v1422_v33  ;;  %v1682_v42 = vld [vmem:[%s2553_s3 + $0x78] sm:$0xff]  ;;  %v1681_v46 = vld [vmem:[%s2553_s3 + $0x70] sm:$0xff]  ;;  %v1672_v54 = vld [vmem:[%s2553_s3 + $0x28] sm:$0xff] }
  0x11   :  { %399 = vmatpush.bf16.msra.mxu2 %v1426_v34  ;;  %488 = vmatpush.bf16.msra.mxu3 %v1430_v37  ;;  %v37_v47 = vld [vmem:[%s2550_s0 + $0x10] sm:$0xff]  ;;  %v38_v48 = vld [vmem:[%s2550_s0 + $0x18] sm:$0xff]  ;;  %v1696_v55 = vld [vmem:[%s2553_s3 + $0xe8] sm:$0xff] }
  0x12   :  { %1463 = vmatmul.msk.bf16.vlgmr.msra.gmra.mxu0 %vm165_vm0, %v67_v39  ;;  %v68_v49 = vpack.c.bf16 %v38_v48, %v37_v47  ;;  %v1680_v56 = vld [vmem:[%s2553_s3 + $0x68] sm:$0xff]  ;;  %v41_v57 = vld [vmem:[%s2550_s0 + $0x30] sm:$0xff]  ;;  %v42_v58 = vld [vmem:[%s2550_s0 + $0x38] sm:$0xff] }
  0x13   :  { %1479 = vmatmul.msk.bf16.vlgmr.msra.gmra.mxu1 %vm165_vm0, %v67_v39  ;;  %1022 = vmatpush.bf16.msrb.mxu0 %v1674_v41  ;;  %v70_v59 = vpack.c.bf16 %v42_v58, %v41_v57  ;;  %v43_v60 = vld [vmem:[%s2550_s0 + $0x40] sm:$0xff]  ;;  %v44_v61 = vld [vmem:[%s2550_s0 + $0x48] sm:$0xff]  ;;  %v45_v3 = vld [vmem:[%s2550_s0 + $0x50] sm:$0xff] }
  0x14   :  { %1495 = vmatmul.msk.bf16.vlgmr.msra.gmra.mxu2 %vm165_vm0, %v67_v39  ;;  %1511 = vmatmul.msk.bf16.vlgmr.msra.gmra.mxu3 %vm165_vm0, %v67_v39  ;;  %v71_v62 = vpack.c.bf16 %v44_v61, %v43_v60  ;;  %v1687_v63 = vld [vmem:[%s2553_s3 + $0xa0] sm:$0xff]  ;;  %v46_v4 = vld [vmem:[%s2550_s0 + $0x58] sm:$0xff]  ;;  %v48_v7 = vld [vmem:[%s2550_s0 + $0x68] sm:$0xff] }
  0x15   :  { %1200 = vmatpush.bf16.msrb.mxu2 %v1690_v38  ;;  %1289 = vmatpush.bf16.msrb.mxu3 %v1698_v40  ;;  %v1671_v0 = vld [vmem:[%s2553_s3 + $0x20] sm:$0xff]  ;;  %v72_v5 = vpack.c.bf16 %v46_v4, %v45_v3  ;;  %v1686_v9 = vld [vmem:[%s2553_s3 + $0x98] sm:$0xff]  ;;  %v49_v13 = vld [vmem:[%s2550_s0 + $0x70] sm:$0xff] }
  0x16   :  { %1111 = vmatpush.bf16.msrb.mxu1 %v1682_v42  ;;  %v1695_v1 = vld [vmem:[%s2553_s3 + $0xe0] sm:$0xff]  ;;  %v1670_v10 = vld [vmem:[%s2553_s3 + $0x18] sm:$0xff]  ;;  %v52_v17 = vld [vmem:[%s2550_s0 + $0x88] sm:$0xff] }
  0x17   :  { %1023 = vmatpush.bf16.msrb.mxu0 %v1673_v44  ;;  %v1679_v2 = vld [vmem:[%s2553_s3 + $0x60] sm:$0xff]  ;;  %v1694_v11 = vld [vmem:[%s2553_s3 + $0xd8] sm:$0xff]  ;;  %v1685_v24 = vld [vmem:[%s2553_s3 + $0x90] sm:$0xff] }
  0x18   :  { %v47_v6 = vld [vmem:[%s2550_s0 + $0x60] sm:$0xff]  ;;  %v1678_v12 = vld [vmem:[%s2553_s3 + $0x58] sm:$0xff]  ;;  %v1669_v25 = vld [vmem:[%s2553_s3 + $0x10] sm:$0xff] }
  0x19   :  { %1201 = vmatpush.bf16.msrb.mxu2 %v1689_v43  ;;  %1290 = vmatpush.bf16.msrb.mxu3 %v1697_v45  ;;  %v73_v8 = vpack.c.bf16 %v48_v7, %v47_v6  ;;  %v50_v14 = vld [vmem:[%s2550_s0 + $0x78] sm:$0xff]  ;;  %v51_v16 = vld [vmem:[%s2550_s0 + $0x80] sm:$0xff]  ;;  %v1693_v26 = vld [vmem:[%s2553_s3 + $0xd0] sm:$0xff] }
  0x1a   :  { %1112 = vmatpush.bf16.msrb.mxu1 %v1681_v46  ;;  %v74_v15 = vpack.c.bf16 %v50_v14, %v49_v13  ;;  %v75_v18 = vpack.c.bf16 %v52_v17, %v51_v16  ;;  %v95_v19 = vld [vmem:[#allocation2] sm:$0xf]  ;;  %v1677_v39 = vld [vmem:[%s2553_s3 + $0x50] sm:$0xff]  ;;  %v54_v43 = vld [vmem:[%s2550_s0 + $0x98] sm:$0xff] }
  0x1b   :  { %1024 = vmatpush.bf16.msrb.mxu0 %v1672_v54  ;;  %v1979_v22 = vperm.slane %v95_v19, 0  ;;  %v1982_v23 = vperm.slane %v95_v19, 1  ;;  %v1999_v34 = vperm.slane %v95_v19, 2  ;;  %v2002_v37 = vperm.slane %v95_v19, 3  ;;  %v53_v42 = vld [vmem:[%s2550_s0 + $0x90] sm:$0xff] }
  0x1d   :  { %1202 = vmatpush.bf16.msrb.mxu2 %v1688_v53  ;;  %1291 = vmatpush.bf16.msrb.mxu3 %v1696_v55 }
  0x1e   :  { %1113 = vmatpush.bf16.msrb.mxu1 %v1680_v56 }
  0x1f   :  { %1025 = vmatpush.bf16.msrb.mxu0 %v1671_v0 }
  0x21   :  { %1203 = vmatpush.bf16.msrb.mxu2 %v1687_v63  ;;  %1292 = vmatpush.bf16.msrb.mxu3 %v1695_v1 }
  0x22   :  { %1464 = vmatmul.msk.bf16.gmra.mxu0 %vm165_vm0, %v68_v49  ;;  %1114 = vmatpush.bf16.msrb.mxu1 %v1679_v2 }
  0x23   :  { %1480 = vmatmul.msk.bf16.gmra.mxu1 %vm165_vm0, %v68_v49  ;;  %1026 = vmatpush.bf16.msrb.mxu0 %v1670_v10  ;;  %v56_v10 = vld [vmem:[%s2550_s0 + $0xa8] sm:$0xff] }
  0x24   :  { %1496 = vmatmul.msk.bf16.gmra.mxu2 %vm165_vm0, %v68_v49  ;;  %1512 = vmatmul.msk.bf16.gmra.mxu3 %vm165_vm0, %v68_v49  ;;  %v76_v49 = vpack.c.bf16 %v54_v43, %v53_v42 }
  0x25   :  { %1204 = vmatpush.bf16.msrb.mxu2 %v1686_v9  ;;  %1293 = vmatpush.bf16.msrb.mxu3 %v1694_v11  ;;  %v55_v9 = vld [vmem:[%s2550_s0 + $0xa0] sm:$0xff] }
  0x26   :  { %1115 = vmatpush.bf16.msrb.mxu1 %v1678_v12  ;;  %v77_v16 = vpack.c.bf16 %v56_v10, %v55_v9 }
  0x27   :  { %1027 = vmatpush.bf16.msrb.mxu0 %v1669_v25 }
  0x29   :  { %1205 = vmatpush.bf16.msrb.mxu2 %v1685_v24  ;;  %1294 = vmatpush.bf16.msrb.mxu3 %v1693_v26 }
  0x2a   :  { %1116 = vmatpush.bf16.msrb.mxu1 %v1677_v39 }
  0x32   :  { %1465 = vmatmul.msk.bf16.gmra.mxu0 %vm165_vm0, %v69_v52 }
  0x33   :  { %1481 = vmatmul.msk.bf16.gmra.mxu1 %vm165_vm0, %v69_v52 }
  0x34   :  { %1497 = vmatmul.msk.bf16.gmra.mxu2 %vm165_vm0, %v69_v52  ;;  %1513 = vmatmul.msk.bf16.gmra.mxu3 %vm165_vm0, %v69_v52 }
  0x42   :  { %1466 = vmatmul.msk.bf16.gmra.mxu0 %vm165_vm0, %v70_v59 }
  0x43   :  { %1482 = vmatmul.msk.bf16.gmra.mxu1 %vm165_vm0, %v70_v59 }
  0x44   :  { %1498 = vmatmul.msk.bf16.gmra.mxu2 %vm165_vm0, %v70_v59  ;;  %1514 = vmatmul.msk.bf16.gmra.mxu3 %vm165_vm0, %v70_v59 }
  0x52   :  { %1467 = vmatmul.msk.bf16.gmra.mxu0 %vm165_vm0, %v71_v62 }
  0x53   :  { %1483 = vmatmul.msk.bf16.gmra.mxu1 %vm165_vm0, %v71_v62 }
  0x54   :  { %1499 = vmatmul.msk.bf16.gmra.mxu2 %vm165_vm0, %v71_v62  ;;  %1515 = vmatmul.msk.bf16.gmra.mxu3 %vm165_vm0, %v71_v62 }
  0x62   :  { %1468 = vmatmul.msk.bf16.gmra.mxu0 %vm165_vm0, %v72_v5 }
  0x63   :  { %1484 = vmatmul.msk.bf16.gmra.mxu1 %vm165_vm0, %v72_v5 }
  0x64   :  { %1500 = vmatmul.msk.bf16.gmra.mxu2 %vm165_vm0, %v72_v5  ;;  %1516 = vmatmul.msk.bf16.gmra.mxu3 %vm165_vm0, %v72_v5 }
  0x72   :  { %1469 = vmatmul.msk.bf16.gmra.mxu0 %vm165_vm0, %v73_v8 }
  0x73   :  { %1485 = vmatmul.msk.bf16.gmra.mxu1 %vm165_vm0, %v73_v8 }
  0x74   :  { %1501 = vmatmul.msk.bf16.gmra.mxu2 %vm165_vm0, %v73_v8  ;;  %1517 = vmatmul.msk.bf16.gmra.mxu3 %vm165_vm0, %v73_v8 }
  0x82   :  { %1470 = vmatmul.msk.bf16.gmra.mxu0 %vm165_vm0, %v74_v15 }
  0x83   :  { %1486 = vmatmul.msk.bf16.gmra.mxu1 %vm165_vm0, %v74_v15 }
  0x84   :  { %1502 = vmatmul.msk.bf16.gmra.mxu2 %vm165_vm0, %v74_v15  ;;  %1518 = vmatmul.msk.bf16.gmra.mxu3 %vm165_vm0, %v74_v15 }
  0x8f   :  { %v223_v20 = vpop.f32.mrf.mxu0 }
  0x90   :  { %v312_v21 = vpop.f32.mrf.mxu1  ;;  %v224_v27 = vadd.f32 %v223_v20, %v1979_v22 }
  0x91   :  { %v313_v29 = vadd.f32 %v312_v21, %v1982_v23 }
  0x92   :  { %1471 = vmatmul.msk.bf16.gmra.mxu0 %vm165_vm0, %v75_v18  ;;  %v570_v36 = vmax.f32 %v224_v27, 0.0 }
  0x93   :  { %1487 = vmatmul.msk.bf16.gmra.mxu1 %vm165_vm0, %v75_v18  ;;  %v571_v40 = vmax.f32 %v313_v29, 0.0  ;;  %v1684_v29 = vld [vmem:[%s2553_s3 + $0x88] sm:$0xff] }
  0x94   :  { %1503 = vmatmul.msk.bf16.gmra.mxu2 %vm165_vm0, %v75_v18  ;;  %1519 = vmatmul.msk.bf16.gmra.mxu3 %vm165_vm0, %v75_v18 }
  0x95   :  { %1206 = vmatpush.bf16.msrb.mxu2 %v1684_v29 }
  0x97   :  { %v401_v28 = vpop.f32.mrf.mxu2  ;;  %v490_v30 = vpop.f32.mrf.mxu3 }
  0x98   :  { %v225_v31 = vpop.f32.mrf.mxu0  ;;  %v314_v33 = vpop.f32.mrf.mxu1  ;;  %v402_v45 = vadd.f32 %v401_v28, %v1999_v34  ;;  %v491_v47 = vadd.f32 %v490_v30, %v2002_v37  ;;  %v1668_v30 = vld [vmem:[%s2553_s3 + $0x8] sm:$0xff] }
  0x99   :  { %v226_v32 = vadd.f32 %v225_v31, %v1979_v22  ;;  %v315_v35 = vadd.f32 %v314_v33, %v1982_v23  ;;  %v1692_v31 = vld [vmem:[%s2553_s3 + $0xc8] sm:$0xff]  ;;  %1028 = vmatpush.bf16.msrb.mxu0 %v1668_v30 }
  0x9a   :  { %v572_v55 = vmax.f32 %v402_v45, 0.0  ;;  %v573_v57 = vmax.f32 %v491_v47, 0.0  ;;  %1295 = vmatpush.bf16.msrb.mxu3 %v1692_v31  ;;  %v1676_v47 = vld [vmem:[%s2553_s3 + $0x48] sm:$0xff] }
  0x9b   :  { %v574_v38 = vmax.f32 %v226_v32, 0.0  ;;  %v575_v41 = vmax.f32 %v315_v35, 0.0  ;;  %1117 = vmatpush.bf16.msrb.mxu1 %v1676_v47  ;;  %v1683_v47 = vld [vmem:[%s2553_s3 + $0x80] sm:$0xff] }
  0x9c   :  { %1207 = vmatpush.bf16.msrb.mxu2 %v1683_v47 }
  0x9d   :  { %v2013_v44 = vpack.c.bf16 %v574_v38, %v570_v36  ;;  %v2016_v46 = vpack.c.bf16 %v575_v41, %v571_v40 }
  0x9f   :  { %v403_v48 = vpop.f32.mrf.mxu2  ;;  %v492_v51 = vpop.f32.mrf.mxu3 }
  0xa0   :  { %v404_v50 = vadd.f32 %v403_v48, %v1999_v34  ;;  %v228_v52 = vpop.f32.mrf.mxu0  ;;  %v493_v53 = vadd.f32 %v492_v51, %v2002_v37  ;;  %v317_v54 = vpop.f32.mrf.mxu1  ;;  %v58_v51 = vld [vmem:[%s2550_s0 + $0xb8] sm:$0xff] }
  0xa1   :  { %v229_v61 = vadd.f32 %v228_v52, %v1979_v22  ;;  %v318_v63 = vadd.f32 %v317_v54, %v1982_v23 }
  0xa2   :  { %v576_v56 = vmax.f32 %v404_v50, 0.0  ;;  %v577_v58 = vmax.f32 %v493_v53, 0.0  ;;  %1472 = vmatmul.msk.bf16.gmra.mxu0 %vm165_vm0, %v76_v49  ;;  %v57_v50 = vld [vmem:[%s2550_s0 + $0xb0] sm:$0xff] }
  0xa3   :  { %1488 = vmatmul.msk.bf16.gmra.mxu1 %vm165_vm0, %v76_v49  ;;  %v578_v5 = vmax.f32 %v229_v61, 0.0  ;;  %v579_v7 = vmax.f32 %v318_v63, 0.0 }
  0xa4   :  { %v2022_v59 = vpack.c.bf16 %v576_v56, %v572_v55  ;;  %1504 = vmatmul.msk.bf16.gmra.mxu2 %vm165_vm0, %v76_v49  ;;  %v2026_v60 = vpack.c.bf16 %v577_v58, %v573_v57  ;;  %1520 = vmatmul.msk.bf16.gmra.mxu3 %vm165_vm0, %v76_v49  ;;  %v78_v57 = vpack.c.bf16 %v58_v51, %v57_v50 }
  0xa7   :  { %v406_v62 = vpop.f32.mrf.mxu2  ;;  %v495_v0 = vpop.f32.mrf.mxu3 }
  0xa8   :  { %v230_v1 = vpop.f32.mrf.mxu0  ;;  %v319_v3 = vpop.f32.mrf.mxu1  ;;  %v407_v12 = vadd.f32 %v406_v62, %v1999_v34  ;;  %v496_v14 = vadd.f32 %v495_v0, %v2002_v37 }
  0xa9   :  { %v231_v2 = vadd.f32 %v230_v1, %v1979_v22  ;;  %v320_v4 = vadd.f32 %v319_v3, %v1982_v23 }
  0xaa   :  { %v580_v24 = vmax.f32 %v407_v12, 0.0  ;;  %v581_v26 = vmax.f32 %v496_v14, 0.0 }
  0xab   :  { %v582_v6 = vmax.f32 %v231_v2, 0.0  ;;  %v583_v8 = vmax.f32 %v320_v4, 0.0 }
  0xad   :  { %v2039_v11 = vpack.c.bf16 %v582_v6, %v578_v5  ;;  %v2042_v13 = vpack.c.bf16 %v583_v8, %v579_v7 }
  0xaf   :  { %v408_v15 = vpop.f32.mrf.mxu2  ;;  %v497_v18 = vpop.f32.mrf.mxu3 }
  0xb0   :  { %v409_v17 = vadd.f32 %v408_v15, %v1999_v34  ;;  %v233_v19 = vpop.f32.mrf.mxu0  ;;  %v498_v20 = vadd.f32 %v497_v18, %v2002_v37  ;;  %v322_v21 = vpop.f32.mrf.mxu1 }
  0xb1   :  { %v234_v33 = vadd.f32 %v233_v19, %v1979_v22  ;;  %v323_v36 = vadd.f32 %v322_v21, %v1982_v23  ;;  %v59_v21 = vld [vmem:[%s2550_s0 + $0xc0] sm:$0xff] }
  0xb2   :  { %v584_v25 = vmax.f32 %v409_v17, 0.0  ;;  %v585_v27 = vmax.f32 %v498_v20, 0.0  ;;  %1473 = vmatmul.msk.bf16.gmra.mxu0 %vm165_vm0, %v77_v16 }
  0xb3   :  { %1489 = vmatmul.msk.bf16.gmra.mxu1 %vm165_vm0, %v77_v16  ;;  %v586_v43 = vmax.f32 %v234_v33, 0.0  ;;  %v587_v48 = vmax.f32 %v323_v36, 0.0 }
  0xb4   :  { %1505 = vmatmul.msk.bf16.gmra.mxu2 %vm165_vm0, %v77_v16  ;;  %v2050_v28 = vpack.c.bf16 %v584_v25, %v580_v24  ;;  %1521 = vmatmul.msk.bf16.gmra.mxu3 %vm165_vm0, %v77_v16  ;;  %v2062_v32 = vpack.c.bf16 %v585_v27, %v581_v26  ;;  %v60_v24 = vld [vmem:[%s2550_s0 + $0xc8] sm:$0xff] }
  0xb5   :  { %v79_v31 = vpack.c.bf16 %v60_v24, %v59_v21 }
  0xb7   :  { %v411_v35 = vpop.f32.mrf.mxu2  ;;  %v500_v38 = vpop.f32.mrf.mxu3 }
  0xb8   :  { %v235_v39 = vpop.f32.mrf.mxu0  ;;  %v324_v41 = vpop.f32.mrf.mxu1  ;;  %v412_v53 = vadd.f32 %v411_v35, %v1999_v34  ;;  %v501_v55 = vadd.f32 %v500_v38, %v2002_v37 }
  0xb9   :  { %v236_v40 = vadd.f32 %v235_v39, %v1979_v22  ;;  %v325_v42 = vadd.f32 %v324_v41, %v1982_v23 }
  0xba   :  { %v588_v1 = vmax.f32 %v412_v53, 0.0  ;;  %v589_v3 = vmax.f32 %v501_v55, 0.0 }
  0xbb   :  { %v590_v45 = vmax.f32 %v236_v40, 0.0  ;;  %v591_v49 = vmax.f32 %v325_v42, 0.0 }
  0xbd   :  { %v2077_v52 = vpack.c.bf16 %v590_v45, %v586_v43  ;;  %v2080_v54 = vpack.c.bf16 %v591_v49, %v587_v48  ;;  %v1667_v48 = vld [vmem:[%s2553_s3] sm:$0xff] }
  0xbe   :  { %v1691_v49 = vld [vmem:[%s2553_s3 + $0xc0] sm:$0xff]  ;;  %1029 = vmatpush.bf16.msrb.mxu0 %v1667_v48 }
  0xbf   :  { %v413_v56 = vpop.f32.mrf.mxu2  ;;  %v502_v61 = vpop.f32.mrf.mxu3  ;;  %1296 = vmatpush.bf16.msrb.mxu3 %v1691_v49 }
  0xc0   :  { %v414_v58 = vadd.f32 %v413_v56, %v1999_v34  ;;  %v238_v62 = vpop.f32.mrf.mxu0  ;;  %v503_v63 = vadd.f32 %v502_v61, %v2002_v37  ;;  %v327_v0 = vpop.f32.mrf.mxu1 }
  0xc1   :  { %v239_v7 = vadd.f32 %v238_v62, %v1979_v22  ;;  %v328_v9 = vadd.f32 %v327_v0, %v1982_v23 }
  0xc2   :  { %v592_v2 = vmax.f32 %v414_v58, 0.0  ;;  %v593_v4 = vmax.f32 %v503_v63, 0.0  ;;  %1474 = vmatmul.msk.bf16.gmra.mxu0 %vm165_vm0, %v78_v57 }
  0xc3   :  { %1490 = vmatmul.msk.bf16.gmra.mxu1 %vm165_vm0, %v78_v57  ;;  %v594_v17 = vmax.f32 %v239_v7, 0.0  ;;  %v595_v19 = vmax.f32 %v328_v9, 0.0  ;;  %v62_v7 = vld [vmem:[%s2550_s0 + $0xd8] sm:$0xff] }
  0xc4   :  { %1506 = vmatmul.msk.bf16.gmra.mxu2 %vm165_vm0, %v78_v57  ;;  %v2088_v5 = vpack.c.bf16 %v592_v2, %v588_v1  ;;  %1522 = vmatmul.msk.bf16.gmra.mxu3 %vm165_vm0, %v78_v57  ;;  %v2091_v6 = vpack.c.bf16 %v593_v4, %v589_v3  ;;  %v1675_v1 = vld [vmem:[%s2553_s3 + $0x40] sm:$0xff]  ;;  %v61_v4 = vld [vmem:[%s2550_s0 + $0xd0] sm:$0xff] }
  0xc5   :  { %1118 = vmatpush.bf16.msrb.mxu1 %v1675_v1 }
  0xc7   :  { %v416_v8 = vpop.f32.mrf.mxu2  ;;  %v505_v10 = vpop.f32.mrf.mxu3 }
  0xc8   :  { %v240_v12 = vpop.f32.mrf.mxu0  ;;  %v329_v15 = vpop.f32.mrf.mxu1  ;;  %v417_v26 = vadd.f32 %v416_v8, %v1999_v34  ;;  %v506_v29 = vadd.f32 %v505_v10, %v2002_v37 }
  0xc9   :  { %v241_v14 = vadd.f32 %v240_v12, %v1979_v22  ;;  %v330_v16 = vadd.f32 %v329_v15, %v1982_v23  ;;  %v80_v15 = vpack.c.bf16 %v62_v7, %v61_v4 }
  0xca   :  { %v596_v40 = vmax.f32 %v417_v26, 0.0  ;;  %v597_v42 = vmax.f32 %v506_v29, 0.0 }
  0xcb   :  { %v598_v18 = vmax.f32 %v241_v14, 0.0  ;;  %v599_v20 = vmax.f32 %v330_v16, 0.0 }
  0xcd   :  { %v2103_v25 = vpack.c.bf16 %v598_v18, %v594_v17  ;;  %v2106_v27 = vpack.c.bf16 %v599_v20, %v595_v19 }
  0xcf   :  { %v418_v30 = vpop.f32.mrf.mxu2  ;;  %v507_v35 = vpop.f32.mrf.mxu3 }
  0xd0   :  { %v419_v33 = vadd.f32 %v418_v30, %v1999_v34  ;;  %v243_v36 = vpop.f32.mrf.mxu0  ;;  %v508_v38 = vadd.f32 %v507_v35, %v2002_v37  ;;  %v332_v39 = vpop.f32.mrf.mxu1 }
  0xd1   :  { %v244_v51 = vadd.f32 %v243_v36, %v1979_v22  ;;  %v333_v55 = vadd.f32 %v332_v39, %v1982_v23 }
  0xd2   :  { %v600_v41 = vmax.f32 %v419_v33, 0.0  ;;  %v601_v43 = vmax.f32 %v508_v38, 0.0  ;;  %1475 = vmatmul.msk.bf16.gmra.mxu0 %vm165_vm0, %v79_v31 }
  0xd3   :  { %1491 = vmatmul.msk.bf16.gmra.mxu1 %vm165_vm0, %v79_v31  ;;  %v602_v63 = vmax.f32 %v244_v51, 0.0  ;;  %v603_v2 = vmax.f32 %v333_v55, 0.0  ;;  %v63_v51 = vld [vmem:[%s2550_s0 + $0xe0] sm:$0xff] }
  0xd4   :  { %1507 = vmatmul.msk.bf16.gmra.mxu2 %vm165_vm0, %v79_v31  ;;  %v2114_v45 = vpack.c.bf16 %v600_v41, %v596_v40  ;;  %1523 = vmatmul.msk.bf16.gmra.mxu3 %vm165_vm0, %v79_v31  ;;  %v2126_v50 = vpack.c.bf16 %v601_v43, %v597_v42 }
  0xd7   :  { %v421_v53 = vpop.f32.mrf.mxu2  ;;  %v510_v56 = vpop.f32.mrf.mxu3 }
  0xd8   :  { %v245_v57 = vpop.f32.mrf.mxu0  ;;  %v334_v61 = vpop.f32.mrf.mxu1  ;;  %v422_v9 = vadd.f32 %v421_v53, %v1999_v34  ;;  %v511_v12 = vadd.f32 %v510_v56, %v2002_v37  ;;  %v64_v53 = vld [vmem:[%s2550_s0 + $0xe8] sm:$0xff] }
  0xd9   :  { %v246_v58 = vadd.f32 %v245_v57, %v1979_v22  ;;  %v335_v62 = vadd.f32 %v334_v61, %v1982_v23 }
  0xda   :  { %v604_v21 = vmax.f32 %v422_v9, 0.0  ;;  %v605_v26 = vmax.f32 %v511_v12, 0.0 }
  0xdb   :  { %v606_v0 = vmax.f32 %v246_v58, 0.0  ;;  %v607_v3 = vmax.f32 %v335_v62, 0.0  ;;  %v81_v62 = vpack.c.bf16 %v64_v53, %v63_v51 }
  0xdd   :  { %v2141_v8 = vpack.c.bf16 %v606_v0, %v602_v63  ;;  %v2144_v10 = vpack.c.bf16 %v607_v3, %v603_v2 }
  0xdf   :  { %v423_v14 = vpop.f32.mrf.mxu2  ;;  %v512_v17 = vpop.f32.mrf.mxu3 }
  0xe0   :  { %v424_v16 = vadd.f32 %v423_v14, %v1999_v34  ;;  %v248_v18 = vpop.f32.mrf.mxu0  ;;  %v513_v19 = vadd.f32 %v512_v17, %v2002_v37  ;;  %v337_v20 = vpop.f32.mrf.mxu1 }
  0xe1   :  { %v249_v33 = vadd.f32 %v248_v18, %v1979_v22  ;;  %v338_v36 = vadd.f32 %v337_v20, %v1982_v23 }
  0xe2   :  { %v608_v24 = vmax.f32 %v424_v16, 0.0  ;;  %v609_v29 = vmax.f32 %v513_v19, 0.0  ;;  %1476 = vmatmul.msk.bf16.gmra.mxu0 %vm165_vm0, %v80_v15 }
  0xe3   :  { %1492 = vmatmul.msk.bf16.gmra.mxu1 %vm165_vm0, %v80_v15  ;;  %v610_v43 = vmax.f32 %v249_v33, 0.0  ;;  %v611_v48 = vmax.f32 %v338_v36, 0.0 }
  0xe4   :  { %1508 = vmatmul.msk.bf16.gmra.mxu2 %vm165_vm0, %v80_v15  ;;  %v2152_v30 = vpack.c.bf16 %v608_v24, %v604_v21  ;;  %1524 = vmatmul.msk.bf16.gmra.mxu3 %vm165_vm0, %v80_v15  ;;  %v2155_v31 = vpack.c.bf16 %v609_v29, %v605_v26 }
  0xe7   :  { %v426_v35 = vpop.f32.mrf.mxu2  ;;  %v515_v38 = vpop.f32.mrf.mxu3 }
  0xe8   :  { %v250_v39 = vpop.f32.mrf.mxu0  ;;  %v339_v41 = vpop.f32.mrf.mxu1  ;;  %v427_v56 = vadd.f32 %v426_v35, %v1999_v34  ;;  %v516_v58 = vadd.f32 %v515_v38, %v2002_v37  ;;  %v65_v38 = vld [vmem:[%s2550_s0 + $0xf0] sm:$0xff] }
  0xe9   :  { %v251_v40 = vadd.f32 %v250_v39, %v1979_v22  ;;  %v340_v42 = vadd.f32 %v339_v41, %v1982_v23  ;;  %v66_v39 = vld [vmem:[%s2550_s0 + $0xf8] sm:$0xff] }
  0xea   :  { %v612_v4 = vmax.f32 %v427_v56, 0.0  ;;  %v613_v9 = vmax.f32 %v516_v58, 0.0 }
  0xeb   :  { %v614_v47 = vmax.f32 %v251_v40, 0.0  ;;  %v615_v49 = vmax.f32 %v340_v42, 0.0 }
  0xed   :  { %v2167_v55 = vpack.c.bf16 %v614_v47, %v610_v43  ;;  %v2170_v57 = vpack.c.bf16 %v615_v49, %v611_v48  ;;  %v82_v48 = vpack.c.bf16 %v66_v39, %v65_v38 }
  0xef   :  { %v428_v61 = vpop.f32.mrf.mxu2  ;;  %v517_v0 = vpop.f32.mrf.mxu3 }
  0xf0   :  { %v429_v63 = vadd.f32 %v428_v61, %v1999_v34  ;;  %v253_v1 = vpop.f32.mrf.mxu0  ;;  %v518_v2 = vadd.f32 %v517_v0, %v2002_v37  ;;  %v342_v3 = vpop.f32.mrf.mxu1 }
  0xf1   :  { %v254_v16 = vadd.f32 %v253_v1, %v1979_v22  ;;  %v343_v18 = vadd.f32 %v342_v3, %v1982_v23 }
  0xf2   :  { %v616_v7 = vmax.f32 %v429_v63, 0.0  ;;  %v617_v12 = vmax.f32 %v518_v2, 0.0  ;;  %1477 = vmatmul.msk.bf16.gmra.mxu0 %vm165_vm0, %v81_v62 }
  0xf3   :  { %1493 = vmatmul.msk.bf16.gmra.mxu1 %vm165_vm0, %v81_v62  ;;  %v618_v29 = vmax.f32 %v254_v16, 0.0  ;;  %v619_v35 = vmax.f32 %v343_v18, 0.0 }
  0xf4   :  { %1509 = vmatmul.msk.bf16.gmra.mxu2 %vm165_vm0, %v81_v62  ;;  %v2178_v14 = vpack.c.bf16 %v616_v7, %v612_v4  ;;  %1525 = vmatmul.msk.bf16.gmra.mxu3 %vm165_vm0, %v81_v62  ;;  %v2181_v15 = vpack.c.bf16 %v617_v12, %v613_v9 }
  0xf7   :  { %v431_v17 = vpop.f32.mrf.mxu2  ;;  %v520_v19 = vpop.f32.mrf.mxu3 }
  0xf8   :  { %v255_v20 = vpop.f32.mrf.mxu0  ;;  %v344_v24 = vpop.f32.mrf.mxu1  ;;  %v432_v41 = vadd.f32 %v431_v17, %v1999_v34  ;;  %v521_v43 = vadd.f32 %v520_v19, %v2002_v37 }
  0xf9   :  { %v256_v21 = vadd.f32 %v255_v20, %v1979_v22  ;;  %v345_v26 = vadd.f32 %v344_v24, %v1982_v23 }
  0xfa   :  { %v620_v61 = vmax.f32 %v432_v41, 0.0  ;;  %v621_v63 = vmax.f32 %v521_v43, 0.0 }
  0xfb   :  { %v622_v33 = vmax.f32 %v256_v21, 0.0  ;;  %v623_v36 = vmax.f32 %v345_v26, 0.0 }
  0xfd   :  { %v2193_v40 = vpack.c.bf16 %v622_v33, %v618_v29  ;;  %v2196_v42 = vpack.c.bf16 %v623_v36, %v619_v35 }
  0xff   :  { %v433_v47 = vpop.f32.mrf.mxu2  ;;  %v522_v51 = vpop.f32.mrf.mxu3 }
 0x100   :  { %v434_v49 = vadd.f32 %v433_v47, %v1999_v34  ;;  %v258_v53 = vpop.f32.mrf.mxu0  ;;  %v523_v56 = vadd.f32 %v522_v51, %v2002_v37  ;;  %v347_v58 = vpop.f32.mrf.mxu1 }
 0x101   :  { %v259_v3 = vadd.f32 %v258_v53, %v1979_v22  ;;  %v348_v7 = vadd.f32 %v347_v58, %v1982_v23 }
 0x102   :  { %v624_v62 = vmax.f32 %v434_v49, 0.0  ;;  %v625_v0 = vmax.f32 %v523_v56, 0.0  ;;  %1478 = vmatmul.msk.bf16.gmra.mxu0 %vm165_vm0, %v82_v48 }
 0x103   :  { %1494 = vmatmul.msk.bf16.gmra.mxu1 %vm165_vm0, %v82_v48  ;;  %v626_v19 = vmax.f32 %v259_v3, 0.0  ;;  %v627_v21 = vmax.f32 %v348_v7, 0.0 }
 0x104   :  { %1510 = vmatmul.msk.bf16.gmra.mxu2 %vm165_vm0, %v82_v48  ;;  %v2204_v1 = vpack.c.bf16 %v624_v62, %v620_v61  ;;  %1526 = vmatmul.msk.bf16.gmra.mxu3 %vm165_vm0, %v82_v48  ;;  %v2207_v2 = vpack.c.bf16 %v625_v0, %v621_v63 }
 0x107   :  { %v436_v4 = vpop.f32.mrf.mxu2  ;;  %v525_v9 = vpop.f32.mrf.mxu3 }
 0x108   :  { %v260_v12 = vpop.f32.mrf.mxu0  ;;  %v349_v17 = vpop.f32.mrf.mxu1  ;;  %v437_v29 = vadd.f32 %v436_v4, %v1999_v34  ;;  %v526_v35 = vadd.f32 %v525_v9, %v2002_v37 }
 0x109   :  { %v261_v16 = vadd.f32 %v260_v12, %v1979_v22  ;;  %v350_v18 = vadd.f32 %v349_v17, %v1982_v23 }
 0x10a   :  { %v628_v48 = vmax.f32 %v437_v29, 0.0  ;;  %v629_v51 = vmax.f32 %v526_v35, 0.0 }
 0x10b   :  { %v630_v20 = vmax.f32 %v261_v16, 0.0  ;;  %v631_v24 = vmax.f32 %v350_v18, 0.0 }
 0x10d   :  { %v2213_v26 = vpack.c.bf16 %v630_v20, %v626_v19  ;;  %v2216_v33 = vpack.c.bf16 %v631_v24, %v627_v21 }
 0x10f   :  { %v438_v36 = vpop.f32.mrf.mxu2  ;;  %v527_v39 = vpop.f32.mrf.mxu3 }
 0x110   :  { %v439_v38 = vadd.f32 %v438_v36, %v1999_v34  ;;  %v263_v41 = vpop.f32.mrf.mxu0  ;;  %v528_v43 = vadd.f32 %v527_v39, %v2002_v37  ;;  %v352_v47 = vpop.f32.mrf.mxu1 }
 0x111   :  { %v264_v61 = vadd.f32 %v263_v41, %v1979_v22  ;;  %v353_v63 = vadd.f32 %v352_v47, %v1982_v23 }
 0x112   :  { %v632_v49 = vmax.f32 %v439_v38, 0.0  ;;  %v633_v53 = vmax.f32 %v528_v43, 0.0  ;;  %1030 = vmatmul.bf16.vlgmr.msrb.gmra.mxu0 %v2013_v44 }
 0x113   :  { %1119 = vmatmul.bf16.vlgmr.msrb.gmra.mxu1 %v2016_v46  ;;  %v634_v7 = vmax.f32 %v264_v61, 0.0  ;;  %v635_v9 = vmax.f32 %v353_v63, 0.0 }
 0x114   :  { %1208 = vmatmul.bf16.vlgmr.msrb.gmra.mxu2 %v2022_v59  ;;  %v2224_v56 = vpack.c.bf16 %v632_v49, %v628_v48  ;;  %1297 = vmatmul.bf16.vlgmr.msrb.gmra.mxu3 %v2026_v60  ;;  %v2227_v58 = vpack.c.bf16 %v633_v53, %v629_v51 }
 0x117   :  { %v441_v62 = vpop.f32.mrf.mxu2  ;;  %v530_v0 = vpop.f32.mrf.mxu3 }
 0x118   :  { %v265_v3 = vpop.f32.mrf.mxu0  ;;  %v354_v44 = vpop.f32.mrf.mxu1  ;;  %v442_v60 = vadd.f32 %v441_v62, %v1999_v34  ;;  %v531_v18 = vadd.f32 %v530_v0, %v2002_v37 }
 0x119   :  { %v266_v4 = vadd.f32 %v265_v3, %v1979_v22  ;;  %v355_v46 = vadd.f32 %v354_v44, %v1982_v23 }
 0x11a   :  { %v636_v36 = vmax.f32 %v442_v60, 0.0  ;;  %v637_v39 = vmax.f32 %v531_v18, 0.0 }
 0x11b   :  { %v638_v59 = vmax.f32 %v266_v4, 0.0  ;;  %v639_v12 = vmax.f32 %v355_v46, 0.0 }
 0x11d   :  { %v2233_v16 = vpack.c.bf16 %v638_v59, %v634_v7  ;;  %v2236_v17 = vpack.c.bf16 %v639_v12, %v635_v9 }
 0x11f   :  { %v443_v19 = vpop.f32.mrf.mxu2  ;;  %v532_v21 = vpop.f32.mrf.mxu3 }
 0x120   :  { %v444_v20 = vadd.f32 %v443_v19, %v1999_v34  ;;  %v268_v24 = vpop.f32.mrf.mxu0  ;;  %v533_v29 = vadd.f32 %v532_v21, %v2002_v37  ;;  %v357_v35 = vpop.f32.mrf.mxu1 }
 0x121   :  { %v269_v48 = vadd.f32 %v268_v24, %v1979_v22  ;;  %v358_v51 = vadd.f32 %v357_v35, %v1982_v23 }
 0x122   :  { %v640_v38 = vmax.f32 %v444_v20, 0.0  ;;  %v641_v41 = vmax.f32 %v533_v29, 0.0  ;;  %1035 = vmatmul.bf16.gmra.mxu0 %v2039_v11 }
 0x123   :  { %1124 = vmatmul.bf16.gmra.mxu1 %v2042_v13  ;;  %v642_v63 = vmax.f32 %v269_v48, 0.0  ;;  %v643_v0 = vmax.f32 %v358_v51, 0.0 }
 0x124   :  { %1213 = vmatmul.bf16.gmra.mxu2 %v2050_v28  ;;  %v2244_v43 = vpack.c.bf16 %v640_v38, %v636_v36  ;;  %1302 = vmatmul.bf16.gmra.mxu3 %v2062_v32  ;;  %v2247_v47 = vpack.c.bf16 %v641_v41, %v637_v39 }
 0x127   :  { %v446_v49 = vpop.f32.mrf.mxu2  ;;  %v535_v53 = vpop.f32.mrf.mxu3 }
 0x128   :  { %v270_v61 = vpop.f32.mrf.mxu0  ;;  %v359_v11 = vpop.f32.mrf.mxu1  ;;  %v447_v32 = vadd.f32 %v446_v49, %v1999_v34  ;;  %v536_v46 = vadd.f32 %v535_v53, %v2002_v37 }
 0x129   :  { %v271_v62 = vadd.f32 %v270_v61, %v1979_v22  ;;  %v360_v13 = vadd.f32 %v359_v11, %v1982_v23 }
 0x12a   :  { %v644_v19 = vmax.f32 %v447_v32, 0.0  ;;  %v645_v21 = vmax.f32 %v536_v46, 0.0 }
 0x12b   :  { %v646_v28 = vmax.f32 %v271_v62, 0.0  ;;  %v647_v3 = vmax.f32 %v360_v13, 0.0 }
 0x12d   :  { %v2253_v4 = vpack.c.bf16 %v646_v28, %v642_v63  ;;  %v2256_v44 = vpack.c.bf16 %v647_v3, %v643_v0 }
 0x12f   :  { %v448_v7 = vpop.f32.mrf.mxu2  ;;  %v537_v9 = vpop.f32.mrf.mxu3 }
 0x130   :  { %v449_v59 = vadd.f32 %v448_v7, %v1999_v34  ;;  %v273_v12 = vpop.f32.mrf.mxu0  ;;  %v538_v60 = vadd.f32 %v537_v9, %v2002_v37  ;;  %v362_v18 = vpop.f32.mrf.mxu1 }
 0x131   :  { %v274_v36 = vadd.f32 %v273_v12, %v1979_v22  ;;  %v363_v39 = vadd.f32 %v362_v18, %v1982_v23 }
 0x132   :  { %v648_v20 = vmax.f32 %v449_v59, 0.0  ;;  %v649_v24 = vmax.f32 %v538_v60, 0.0  ;;  %1040 = vmatmul.bf16.gmra.mxu0 %v2077_v52 }
 0x133   :  { %1129 = vmatmul.bf16.gmra.mxu1 %v2080_v54  ;;  %v650_v51 = vmax.f32 %v274_v36, 0.0  ;;  %v651_v53 = vmax.f32 %v363_v39, 0.0 }
 0x134   :  { %1218 = vmatmul.bf16.gmra.mxu2 %v2088_v5  ;;  %v2264_v29 = vpack.c.bf16 %v648_v20, %v644_v19  ;;  %1307 = vmatmul.bf16.gmra.mxu3 %v2091_v6  ;;  %v2267_v35 = vpack.c.bf16 %v649_v24, %v645_v21 }
 0x137   :  { %v451_v38 = vpop.f32.mrf.mxu2  ;;  %v540_v41 = vpop.f32.mrf.mxu3 }
 0x138   :  { %v275_v48 = vpop.f32.mrf.mxu0  ;;  %v364_v52 = vpop.f32.mrf.mxu1  ;;  %v452_v6 = vadd.f32 %v451_v38, %v1999_v34  ;;  %v541_v13 = vadd.f32 %v540_v41, %v2002_v37 }
 0x139   :  { %v276_v49 = vadd.f32 %v275_v48, %v1979_v22  ;;  %v365_v54 = vadd.f32 %v364_v52, %v1982_v23 }
 0x13a   :  { %v652_v7 = vmax.f32 %v452_v6, 0.0  ;;  %v653_v9 = vmax.f32 %v541_v13, 0.0 }
 0x13b   :  { %v654_v5 = vmax.f32 %v276_v49, 0.0  ;;  %v655_v61 = vmax.f32 %v365_v54, 0.0 }
 0x13d   :  { %v2273_v62 = vpack.c.bf16 %v654_v5, %v650_v51  ;;  %v2276_v11 = vpack.c.bf16 %v655_v61, %v651_v53 }
 0x13f   :  { %v453_v63 = vpop.f32.mrf.mxu2  ;;  %v542_v0 = vpop.f32.mrf.mxu3 }
 0x140   :  { %v454_v28 = vadd.f32 %v453_v63, %v1999_v34  ;;  %v278_v3 = vpop.f32.mrf.mxu0  ;;  %v543_v32 = vadd.f32 %v542_v0, %v2002_v37  ;;  %v367_v46 = vpop.f32.mrf.mxu1 }
 0x141   :  { %v279_v19 = vadd.f32 %v278_v3, %v1979_v22  ;;  %v368_v21 = vadd.f32 %v367_v46, %v1982_v23 }
 0x142   :  { %v656_v59 = vmax.f32 %v454_v28, 0.0  ;;  %v657_v12 = vmax.f32 %v543_v32, 0.0  ;;  %1045 = vmatmul.bf16.gmra.mxu0 %v2103_v25 }
 0x143   :  { %1134 = vmatmul.bf16.gmra.mxu1 %v2106_v27  ;;  %v658_v39 = vmax.f32 %v279_v19, 0.0  ;;  %v659_v41 = vmax.f32 %v368_v21, 0.0 }
 0x144   :  { %1223 = vmatmul.bf16.gmra.mxu2 %v2114_v45  ;;  %v2284_v60 = vpack.c.bf16 %v656_v59, %v652_v7  ;;  %1312 = vmatmul.bf16.gmra.mxu3 %v2126_v50  ;;  %v2287_v18 = vpack.c.bf16 %v657_v12, %v653_v9 }
 0x147   :  { %v456_v20 = vpop.f32.mrf.mxu2  ;;  %v545_v24 = vpop.f32.mrf.mxu3 }
 0x148   :  { %v280_v36 = vpop.f32.mrf.mxu0  ;;  %v369_v25 = vpop.f32.mrf.mxu1  ;;  %v457_v50 = vadd.f32 %v456_v20, %v1999_v34  ;;  %v546_v54 = vadd.f32 %v545_v24, %v2002_v37 }
 0x149   :  { %v281_v38 = vadd.f32 %v280_v36, %v1979_v22  ;;  %v370_v27 = vadd.f32 %v369_v25, %v1982_v23 }
 0x14a   :  { %v660_v63 = vmax.f32 %v457_v50, 0.0  ;;  %v661_v0 = vmax.f32 %v546_v54, 0.0 }
 0x14b   :  { %v662_v45 = vmax.f32 %v281_v38, 0.0  ;;  %v663_v48 = vmax.f32 %v370_v27, 0.0 }
 0x14d   :  { %v2293_v49 = vpack.c.bf16 %v662_v45, %v658_v39  ;;  %v2296_v52 = vpack.c.bf16 %v663_v48, %v659_v41 }
 0x14f   :  { %v458_v51 = vpop.f32.mrf.mxu2  ;;  %v547_v53 = vpop.f32.mrf.mxu3 }
 0x150   :  { %v459_v5 = vadd.f32 %v458_v51, %v1999_v34  ;;  %v283_v61 = vpop.f32.mrf.mxu0  ;;  %v548_v6 = vadd.f32 %v547_v53, %v2002_v37  ;;  %v372_v13 = vpop.f32.mrf.mxu1 }
 0x151   :  { %v284_v7 = vadd.f32 %v283_v61, %v1979_v22  ;;  %v373_v9 = vadd.f32 %v372_v13, %v1982_v23 }
 0x152   :  { %v664_v28 = vmax.f32 %v459_v5, 0.0  ;;  %v665_v3 = vmax.f32 %v548_v6, 0.0  ;;  %1050 = vmatmul.bf16.gmra.mxu0 %v2141_v8 }
 0x153   :  { %1139 = vmatmul.bf16.gmra.mxu1 %v2144_v10  ;;  %v666_v21 = vmax.f32 %v284_v7, 0.0  ;;  %v667_v24 = vmax.f32 %v373_v9, 0.0 }
 0x154   :  { %1228 = vmatmul.bf16.gmra.mxu2 %v2152_v30  ;;  %v2304_v32 = vpack.c.bf16 %v664_v28, %v660_v63  ;;  %1317 = vmatmul.bf16.gmra.mxu3 %v2155_v31  ;;  %v2307_v46 = vpack.c.bf16 %v665_v3, %v661_v0 }
 0x157   :  { %v461_v59 = vpop.f32.mrf.mxu2  ;;  %v550_v12 = vpop.f32.mrf.mxu3 }
 0x158   :  { %v285_v19 = vpop.f32.mrf.mxu0  ;;  %v374_v8 = vpop.f32.mrf.mxu1  ;;  %v462_v31 = vadd.f32 %v461_v59, %v1999_v34  ;;  %v551_v27 = vadd.f32 %v550_v12, %v2002_v37 }
 0x159   :  { %v286_v20 = vadd.f32 %v285_v19, %v1979_v22  ;;  %v375_v10 = vadd.f32 %v374_v8, %v1982_v23 }
 0x15a   :  { %v668_v51 = vmax.f32 %v462_v31, 0.0  ;;  %v669_v53 = vmax.f32 %v551_v27, 0.0 }
 0x15b   :  { %v670_v30 = vmax.f32 %v286_v20, 0.0  ;;  %v671_v36 = vmax.f32 %v375_v10, 0.0 }
 0x15d   :  { %v2313_v38 = vpack.c.bf16 %v670_v30, %v666_v21  ;;  %v2316_v25 = vpack.c.bf16 %v671_v36, %v667_v24 }
 0x15f   :  { %v463_v39 = vpop.f32.mrf.mxu2  ;;  %v552_v41 = vpop.f32.mrf.mxu3 }
 0x160   :  { %v464_v45 = vadd.f32 %v463_v39, %v1999_v34  ;;  %v288_v48 = vpop.f32.mrf.mxu0  ;;  %v553_v50 = vadd.f32 %v552_v41, %v2002_v37  ;;  %v377_v54 = vpop.f32.mrf.mxu1 }
 0x161   :  { %v289_v63 = vadd.f32 %v288_v48, %v1979_v22  ;;  %v378_v0 = vadd.f32 %v377_v54, %v1982_v23 }
 0x162   :  { %v672_v5 = vmax.f32 %v464_v45, 0.0  ;;  %v673_v61 = vmax.f32 %v553_v50, 0.0  ;;  %1055 = vmatmul.bf16.gmra.mxu0 %v2167_v55 }
 0x163   :  { %1144 = vmatmul.bf16.gmra.mxu1 %v2170_v57  ;;  %v674_v9 = vmax.f32 %v289_v63, 0.0  ;;  %v675_v12 = vmax.f32 %v378_v0, 0.0 }
 0x164   :  { %1233 = vmatmul.bf16.gmra.mxu2 %v2178_v14  ;;  %v2324_v6 = vpack.c.bf16 %v672_v5, %v668_v51  ;;  %1322 = vmatmul.bf16.gmra.mxu3 %v2181_v15  ;;  %v2327_v13 = vpack.c.bf16 %v673_v61, %v669_v53 }
 0x167   :  { %v466_v28 = vpop.f32.mrf.mxu2  ;;  %v555_v3 = vpop.f32.mrf.mxu3 }
 0x168   :  { %v290_v7 = vpop.f32.mrf.mxu0  ;;  %v379_v55 = vpop.f32.mrf.mxu1  ;;  %v467_v15 = vadd.f32 %v466_v28, %v1999_v34  ;;  %v556_v10 = vadd.f32 %v555_v3, %v2002_v37 }
 0x169   :  { %v291_v59 = vadd.f32 %v290_v7, %v1979_v22  ;;  %v380_v57 = vadd.f32 %v379_v55, %v1982_v23 }
 0x16a   :  { %v676_v39 = vmax.f32 %v467_v15, 0.0  ;;  %v677_v41 = vmax.f32 %v556_v10, 0.0 }
 0x16b   :  { %v678_v14 = vmax.f32 %v291_v59, 0.0  ;;  %v679_v19 = vmax.f32 %v380_v57, 0.0 }
 0x16d   :  { %v2333_v20 = vpack.c.bf16 %v678_v14, %v674_v9  ;;  %v2336_v8 = vpack.c.bf16 %v679_v19, %v675_v12 }
 0x16f   :  { %v468_v21 = vpop.f32.mrf.mxu2  ;;  %v557_v24 = vpop.f32.mrf.mxu3 }
 0x170   :  { %v469_v30 = vadd.f32 %v468_v21, %v1999_v34  ;;  %v293_v36 = vpop.f32.mrf.mxu0  ;;  %v558_v31 = vadd.f32 %v557_v24, %v2002_v37  ;;  %v382_v27 = vpop.f32.mrf.mxu1 }
 0x171   :  { %v294_v51 = vadd.f32 %v293_v36, %v1979_v22  ;;  %v383_v53 = vadd.f32 %v382_v27, %v1982_v23 }
 0x172   :  { %v680_v45 = vmax.f32 %v469_v30, 0.0  ;;  %v681_v48 = vmax.f32 %v558_v31, 0.0  ;;  %1060 = vmatmul.bf16.gmra.mxu0 %v2193_v40 }
 0x173   :  { %1149 = vmatmul.bf16.gmra.mxu1 %v2196_v42  ;;  %v682_v0 = vmax.f32 %v294_v51, 0.0  ;;  %v683_v3 = vmax.f32 %v383_v53, 0.0 }
 0x174   :  { %1238 = vmatmul.bf16.gmra.mxu2 %v2204_v1  ;;  %v2344_v50 = vpack.c.bf16 %v680_v45, %v676_v39  ;;  %1327 = vmatmul.bf16.gmra.mxu3 %v2207_v2  ;;  %v2347_v54 = vpack.c.bf16 %v681_v48, %v677_v41 }
 0x177   :  { %v471_v5 = vpop.f32.mrf.mxu2  ;;  %v560_v61 = vpop.f32.mrf.mxu3 }
 0x178   :  { %v295_v63 = vpop.f32.mrf.mxu0  ;;  %v384_v40 = vpop.f32.mrf.mxu1  ;;  %v472_v2 = vadd.f32 %v471_v5, %v1999_v34  ;;  %v561_v57 = vadd.f32 %v560_v61, %v2002_v37 }
 0x179   :  { %v296_v28 = vadd.f32 %v295_v63, %v1979_v22  ;;  %v385_v42 = vadd.f32 %v384_v40, %v1982_v23  ;;  %v2379_v40 = vld [vmem:[%s2554_s4] ss:$0 sm:$0xff] }
 0x17a   :  { %v684_v21 = vmax.f32 %v472_v2, 0.0  ;;  %v685_v24 = vmax.f32 %v561_v57, 0.0 }
 0x17b   :  { %v686_v1 = vmax.f32 %v296_v28, 0.0  ;;  %v687_v7 = vmax.f32 %v385_v42, 0.0 }
 0x17d   :  { %v2353_v59 = vpack.c.bf16 %v686_v1, %v682_v0  ;;  %v2356_v55 = vpack.c.bf16 %v687_v7, %v683_v3 }
 0x17f   :  { %v473_v9 = vpop.f32.mrf.mxu2  ;;  %v562_v12 = vpop.f32.mrf.mxu3 }
 0x180   :  { %v474_v14 = vadd.f32 %v473_v9, %v1999_v34  ;;  %v298_v19 = vpop.f32.mrf.mxu0  ;;  %v563_v15 = vadd.f32 %v562_v12, %v2002_v37  ;;  %v387_v10 = vpop.f32.mrf.mxu1 }
 0x181   :  { %v299_v39 = vadd.f32 %v298_v19, %v1979_v22  ;;  %v388_v41 = vadd.f32 %v387_v10, %v1982_v23 }
 0x182   :  { %v688_v30 = vmax.f32 %v474_v14, 0.0  ;;  %v689_v36 = vmax.f32 %v563_v15, 0.0  ;;  %1065 = vmatmul.bf16.gmra.mxu0 %v2213_v26 }
 0x183   :  { %1154 = vmatmul.bf16.gmra.mxu1 %v2216_v33  ;;  %v690_v53 = vmax.f32 %v299_v39, 0.0  ;;  %v691_v61 = vmax.f32 %v388_v41, 0.0 }
 0x184   :  { %1243 = vmatmul.bf16.gmra.mxu2 %v2224_v56  ;;  %v2364_v31 = vpack.c.bf16 %v688_v30, %v684_v21  ;;  %1332 = vmatmul.bf16.gmra.mxu3 %v2227_v58  ;;  %v2367_v27 = vpack.c.bf16 %v689_v36, %v685_v24 }
 0x187   :  { %v476_v45 = vpop.f32.mrf.mxu2  ;;  %v565_v48 = vpop.f32.mrf.mxu3 }
 0x188   :  { %v300_v51 = vpop.f32.mrf.mxu0  ;;  %v389_v26 = vpop.f32.mrf.mxu1  ;;  %v477_v58 = vadd.f32 %v476_v45, %v1999_v34 }
 0x189   :  { %v301_v5 = vadd.f32 %v300_v51, %v1979_v22  ;;  %v390_v33 = vadd.f32 %v389_v26, %v1982_v23  ;;  %v566_v22 = vadd.f32 %v565_v48, %v2002_v37 }
 0x18a   :  { %v692_v57 = vmax.f32 %v477_v58, 0.0 }
 0x18b   :  { %v694_v56 = vmax.f32 %v301_v5, 0.0  ;;  %v695_v63 = vmax.f32 %v390_v33, 0.0  ;;  %v693_v12 = vmax.f32 %v566_v22, 0.0 }
 0x18d   :  { %v2373_v28 = vpack.c.bf16 %v694_v56, %v690_v53  ;;  %v2381_v42 = vpack.c.bf16 %v695_v63, %v691_v61 }
 0x18f   :  { %v478_v0 = vpop.f32.mrf.mxu2  ;;  %v567_v1 = vpop.f32.mrf.mxu3 }
 0x190   :  { %v479_v23 = vadd.f32 %v478_v0, %v1999_v34  ;;  %v1031_v3 = vpop.f32.mrf.mxu0  ;;  %v568_v7 = vadd.f32 %v567_v1, %v2002_v37  ;;  %v1120_v2 = vpop.f32.mrf.mxu1 }
 0x191   :  { %v1032_v14 = vadd.f32 %v2379_v40, %v1031_v3 }
 0x192   :  { %v696_v9 = vmax.f32 %v479_v23, 0.0  ;;  %v697_v19 = vmax.f32 %v568_v7, 0.0  ;;  %1070 = vmatmul.bf16.gmra.mxu0 %v2233_v16 }
 0x193   :  { %1159 = vmatmul.bf16.gmra.mxu1 %v2236_v17  ;;  %v1121_v37 = vadd.f32 %v1120_v2, %v1032_v14 }
 0x194   :  { %1248 = vmatmul.bf16.gmra.mxu2 %v2244_v43  ;;  %v2390_v15 = vpack.c.bf16 %v696_v9, %v692_v57  ;;  %1337 = vmatmul.bf16.gmra.mxu3 %v2247_v47  ;;  %v2393_v34 = vpack.c.bf16 %v697_v19, %v693_v12 }
 0x197   :  { %v1209_v10 = vpop.f32.mrf.mxu2  ;;  %v1298_v30 = vpop.f32.mrf.mxu3 }
 0x198   :  { %v1210_v21 = vadd.f32 %v1209_v10, %v1121_v37  ;;  %v1033_v24 = vpop.f32.mrf.mxu0  ;;  %v1122_v36 = vpop.f32.mrf.mxu1 }
 0x199   :  { %v1034_v45 = vadd.f32 %v2379_v40, %v1033_v24 }
 0x19a   :  { %v1299_v39 = vadd.f32 %v1298_v30, %v1210_v21 }
 0x19b   :  { %v1123_v16 = vadd.f32 %v1122_v36, %v1034_v45 }
 0x19c   :  { %1378 = vst [vmem:[%s2555_s5] sm:$0xff] %v1299_v39 }
 0x19f   :  { %v1211_v17 = vpop.f32.mrf.mxu2  ;;  %v1300_v41 = vpop.f32.mrf.mxu3 }
 0x1a0   :  { %v1212_v43 = vadd.f32 %v1211_v17, %v1123_v16  ;;  %v1036_v47 = vpop.f32.mrf.mxu0  ;;  %v1125_v48 = vpop.f32.mrf.mxu1 }
 0x1a1   :  { %v1037_v5 = vadd.f32 %v2379_v40, %v1036_v47 }
 0x1a2   :  { %v1301_v51 = vadd.f32 %v1300_v41, %v1212_v43  ;;  %1075 = vmatmul.bf16.gmra.mxu0 %v2253_v4 }
 0x1a3   :  { %1164 = vmatmul.bf16.gmra.mxu1 %v2256_v44  ;;  %v1126_v26 = vadd.f32 %v1125_v48, %v1037_v5 }
 0x1a4   :  { %1379 = vst [vmem:[%s2555_s5 + $0x8] sm:$0xff] %v1301_v51  ;;  %1253 = vmatmul.bf16.gmra.mxu2 %v2264_v29  ;;  %1342 = vmatmul.bf16.gmra.mxu3 %v2267_v35 }
 0x1a7   :  { %v1214_v33 = vpop.f32.mrf.mxu2  ;;  %v1303_v56 = vpop.f32.mrf.mxu3 }
 0x1a8   :  { %v1215_v53 = vadd.f32 %v1214_v33, %v1126_v26  ;;  %v1038_v61 = vpop.f32.mrf.mxu0  ;;  %v1127_v63 = vpop.f32.mrf.mxu1 }
 0x1a9   :  { %v1039_v22 = vadd.f32 %v2379_v40, %v1038_v61 }
 0x1aa   :  { %v1304_v58 = vadd.f32 %v1303_v56, %v1215_v53 }
 0x1ab   :  { %v1128_v4 = vadd.f32 %v1127_v63, %v1039_v22 }
 0x1ac   :  { %1380 = vst [vmem:[%s2555_s5 + $0x10] sm:$0xff] %v1304_v58 }
 0x1af   :  { %v1216_v0 = vpop.f32.mrf.mxu2  ;;  %v1305_v23 = vpop.f32.mrf.mxu3 }
 0x1b0   :  { %v1217_v44 = vadd.f32 %v1216_v0, %v1128_v4  ;;  %v1041_v29 = vpop.f32.mrf.mxu0  ;;  %v1130_v1 = vpop.f32.mrf.mxu1 }
 0x1b1   :  { %v1042_v3 = vadd.f32 %v2379_v40, %v1041_v29 }
 0x1b2   :  { %v1306_v35 = vadd.f32 %v1305_v23, %v1217_v44  ;;  %1080 = vmatmul.bf16.gmra.mxu0 %v2273_v62 }
 0x1b3   :  { %1169 = vmatmul.bf16.gmra.mxu1 %v2276_v11  ;;  %v1131_v7 = vadd.f32 %v1130_v1, %v1042_v3 }
 0x1b4   :  { %1381 = vst [vmem:[%s2555_s5 + $0x18] sm:$0xff] %v1306_v35  ;;  %1258 = vmatmul.bf16.gmra.mxu2 %v2284_v60  ;;  %1347 = vmatmul.bf16.gmra.mxu3 %v2287_v18 }
 0x1b7   :  { %v1219_v2 = vpop.f32.mrf.mxu2  ;;  %v1308_v9 = vpop.f32.mrf.mxu3 }
 0x1b8   :  { %v1220_v57 = vadd.f32 %v1219_v2, %v1131_v7  ;;  %v1043_v14 = vpop.f32.mrf.mxu0  ;;  %v1132_v12 = vpop.f32.mrf.mxu1 }
 0x1b9   :  { %v1044_v37 = vadd.f32 %v2379_v40, %v1043_v14 }
 0x1ba   :  { %v1309_v19 = vadd.f32 %v1308_v9, %v1220_v57 }
 0x1bb   :  { %v1133_v62 = vadd.f32 %v1132_v12, %v1044_v37 }
 0x1bc   :  { %1382 = vst [vmem:[%s2555_s5 + $0x20] sm:$0xff] %v1309_v19 }
 0x1bf   :  { %v1221_v10 = vpop.f32.mrf.mxu2  ;;  %v1310_v21 = vpop.f32.mrf.mxu3 }
 0x1c0   :  { %v1222_v11 = vadd.f32 %v1221_v10, %v1133_v62  ;;  %v1046_v60 = vpop.f32.mrf.mxu0  ;;  %v1135_v30 = vpop.f32.mrf.mxu1 }
 0x1c1   :  { %v1047_v24 = vadd.f32 %v2379_v40, %v1046_v60 }
 0x1c2   :  { %v1311_v18 = vadd.f32 %v1310_v21, %v1222_v11  ;;  %1085 = vmatmul.bf16.gmra.mxu0 %v2293_v49 }
 0x1c3   :  { %1174 = vmatmul.bf16.gmra.mxu1 %v2296_v52  ;;  %v1136_v36 = vadd.f32 %v1135_v30, %v1047_v24 }
 0x1c4   :  { %1383 = vst [vmem:[%s2555_s5 + $0x28] sm:$0xff] %v1311_v18  ;;  %1263 = vmatmul.bf16.gmra.mxu2 %v2304_v32  ;;  %1352 = vmatmul.bf16.gmra.mxu3 %v2307_v46 }
 0x1c7   :  { %v1224_v39 = vpop.f32.mrf.mxu2  ;;  %v1313_v16 = vpop.f32.mrf.mxu3 }
 0x1c8   :  { %v1225_v45 = vadd.f32 %v1224_v39, %v1136_v36  ;;  %v1048_v17 = vpop.f32.mrf.mxu0  ;;  %v1137_v43 = vpop.f32.mrf.mxu1 }
 0x1c9   :  { %v1049_v47 = vadd.f32 %v2379_v40, %v1048_v17 }
 0x1ca   :  { %v1314_v41 = vadd.f32 %v1313_v16, %v1225_v45 }
 0x1cb   :  { %v1138_v49 = vadd.f32 %v1137_v43, %v1049_v47 }
 0x1cc   :  { %1384 = vst [vmem:[%s2555_s5 + $0x30] sm:$0xff] %v1314_v41 }
 0x1cf   :  { %v1226_v48 = vpop.f32.mrf.mxu2  ;;  %v1315_v51 = vpop.f32.mrf.mxu3 }
 0x1d0   :  { %v1227_v52 = vadd.f32 %v1226_v48, %v1138_v49  ;;  %v1051_v32 = vpop.f32.mrf.mxu0  ;;  %v1140_v5 = vpop.f32.mrf.mxu1 }
 0x1d1   :  { %v1052_v26 = vadd.f32 %v2379_v40, %v1051_v32 }
 0x1d2   :  { %v1316_v46 = vadd.f32 %v1315_v51, %v1227_v52  ;;  %1090 = vmatmul.bf16.gmra.mxu0 %v2313_v38 }
 0x1d3   :  { %1179 = vmatmul.bf16.gmra.mxu1 %v2316_v25  ;;  %v1141_v33 = vadd.f32 %v1140_v5, %v1052_v26 }
 0x1d4   :  { %1385 = vst [vmem:[%s2555_s5 + $0x38] sm:$0xff] %v1316_v46  ;;  %1268 = vmatmul.bf16.gmra.mxu2 %v2324_v6  ;;  %1357 = vmatmul.bf16.gmra.mxu3 %v2327_v13 }
 0x1d7   :  { %v1229_v53 = vpop.f32.mrf.mxu2  ;;  %v1318_v61 = vpop.f32.mrf.mxu3 }
 0x1d8   :  { %v1230_v56 = vadd.f32 %v1229_v53, %v1141_v33  ;;  %v1053_v63 = vpop.f32.mrf.mxu0  ;;  %v1142_v58 = vpop.f32.mrf.mxu1 }
 0x1d9   :  { %v1054_v4 = vadd.f32 %v2379_v40, %v1053_v63 }
 0x1da   :  { %v1319_v22 = vadd.f32 %v1318_v61, %v1230_v56 }
 0x1db   :  { %v1143_v38 = vadd.f32 %v1142_v58, %v1054_v4 }
 0x1dc   :  { %1386 = vst [vmem:[%s2555_s5 + $0x40] sm:$0xff] %v1319_v22 }
 0x1df   :  { %v1231_v0 = vpop.f32.mrf.mxu2  ;;  %v1320_v44 = vpop.f32.mrf.mxu3 }
 0x1e0   :  { %v1232_v25 = vadd.f32 %v1231_v0, %v1143_v38  ;;  %v1056_v6 = vpop.f32.mrf.mxu0  ;;  %v1145_v23 = vpop.f32.mrf.mxu1 }
 0x1e1   :  { %v1057_v29 = vadd.f32 %v2379_v40, %v1056_v6 }
 0x1e2   :  { %v1321_v13 = vadd.f32 %v1320_v44, %v1232_v25  ;;  %1095 = vmatmul.bf16.gmra.mxu0 %v2333_v20 }
 0x1e3   :  { %1184 = vmatmul.bf16.gmra.mxu1 %v2336_v8  ;;  %v1146_v1 = vadd.f32 %v1145_v23, %v1057_v29 }
 0x1e4   :  { %1387 = vst [vmem:[%s2555_s5 + $0x48] sm:$0xff] %v1321_v13  ;;  %1273 = vmatmul.bf16.gmra.mxu2 %v2344_v50  ;;  %1362 = vmatmul.bf16.gmra.mxu3 %v2347_v54 }
 0x1e7   :  { %v1234_v35 = vpop.f32.mrf.mxu2  ;;  %v1323_v7 = vpop.f32.mrf.mxu3 }
 0x1e8   :  { %v1235_v3 = vadd.f32 %v1234_v35, %v1146_v1  ;;  %v1058_v2 = vpop.f32.mrf.mxu0  ;;  %v1147_v57 = vpop.f32.mrf.mxu1 }
 0x1e9   :  { %v1059_v14 = vadd.f32 %v2379_v40, %v1058_v2 }
 0x1ea   :  { %v1324_v9 = vadd.f32 %v1323_v7, %v1235_v3 }
 0x1eb   :  { %v1148_v20 = vadd.f32 %v1147_v57, %v1059_v14 }
 0x1ec   :  { %1388 = vst [vmem:[%s2555_s5 + $0x50] sm:$0xff] %v1324_v9 }
 0x1ef   :  { %v1236_v12 = vpop.f32.mrf.mxu2  ;;  %v1325_v19 = vpop.f32.mrf.mxu3 }
 0x1f0   :  { %v1237_v8 = vadd.f32 %v1236_v12, %v1148_v20  ;;  %v1061_v50 = vpop.f32.mrf.mxu0  ;;  %v1150_v37 = vpop.f32.mrf.mxu1 }
 0x1f1   :  { %v1062_v62 = vadd.f32 %v2379_v40, %v1061_v50 }
 0x1f2   :  { %v1326_v54 = vadd.f32 %v1325_v19, %v1237_v8  ;;  %1100 = vmatmul.bf16.gmra.mxu0 %v2353_v59 }
 0x1f3   :  { %1189 = vmatmul.bf16.gmra.mxu1 %v2356_v55  ;;  %v1151_v10 = vadd.f32 %v1150_v37, %v1062_v62 }
 0x1f4   :  { %1389 = vst [vmem:[%s2555_s5 + $0x58] sm:$0xff] %v1326_v54  ;;  %1278 = vmatmul.bf16.gmra.mxu2 %v2364_v31  ;;  %1367 = vmatmul.bf16.gmra.mxu3 %v2367_v27 }
 0x1f7   :  { %v1239_v11 = vpop.f32.mrf.mxu2  ;;  %v1328_v60 = vpop.f32.mrf.mxu3 }
 0x1f8   :  { %v1240_v21 = vadd.f32 %v1239_v11, %v1151_v10  ;;  %v1063_v30 = vpop.f32.mrf.mxu0  ;;  %v1152_v18 = vpop.f32.mrf.mxu1 }
 0x1f9   :  { %v1064_v36 = vadd.f32 %v2379_v40, %v1063_v30 }
 0x1fa   :  { %v1329_v24 = vadd.f32 %v1328_v60, %v1240_v21 }
 0x1fb   :  { %v1153_v59 = vadd.f32 %v1152_v18, %v1064_v36 }
 0x1fc   :  { %1390 = vst [vmem:[%s2555_s5 + $0x60] sm:$0xff] %v1329_v24 }
 0x1ff   :  { %v1241_v39 = vpop.f32.mrf.mxu2  ;;  %v1330_v45 = vpop.f32.mrf.mxu3 }
 0x200   :  { %v1242_v55 = vadd.f32 %v1241_v39, %v1153_v59  ;;  %v1066_v31 = vpop.f32.mrf.mxu0  ;;  %v1155_v16 = vpop.f32.mrf.mxu1 }
 0x201   :  { %v1067_v17 = vadd.f32 %v2379_v40, %v1066_v31 }
 0x202   :  { %v1331_v27 = vadd.f32 %v1330_v45, %v1242_v55  ;;  %1105 = vmatmul.bf16.gmra.mxu0 %v2373_v28 }
 0x203   :  { %1194 = vmatmul.bf16.gmra.mxu1 %v2381_v42  ;;  %v1156_v43 = vadd.f32 %v1155_v16, %v1067_v17 }
 0x204   :  { %1391 = vst [vmem:[%s2555_s5 + $0x68] sm:$0xff] %v1331_v27  ;;  %1283 = vmatmul.bf16.gmra.mxu2 %v2390_v15  ;;  %1372 = vmatmul.bf16.gmra.mxu3 %v2393_v34 }
 0x207   :  { %v1244_v41 = vpop.f32.mrf.mxu2  ;;  %v1333_v49 = vpop.f32.mrf.mxu3 }
 0x208   :  { %v1245_v47 = vadd.f32 %v1244_v41, %v1156_v43  ;;  %v1068_v48 = vpop.f32.mrf.mxu0  ;;  %v1157_v52 = vpop.f32.mrf.mxu1 }
 0x209   :  { %v1069_v32 = vadd.f32 %v2379_v40, %v1068_v48 }
 0x20a   :  { %v1334_v51 = vadd.f32 %v1333_v49, %v1245_v47 }
 0x20b   :  { %v1158_v28 = vadd.f32 %v1157_v52, %v1069_v32 }
 0x20c   :  { %1392 = vst [vmem:[%s2555_s5 + $0x70] sm:$0xff] %v1334_v51 }
 0x20f   :  { %v1246_v5 = vpop.f32.mrf.mxu2  ;;  %v1335_v46 = vpop.f32.mrf.mxu3 }
 0x210   :  { %v1247_v42 = vadd.f32 %v1246_v5, %v1158_v28  ;;  %v1071_v15 = vpop.f32.mrf.mxu0  ;;  %v1160_v26 = vpop.f32.mrf.mxu1 }
 0x211   :  { %v1072_v33 = vadd.f32 %v2379_v40, %v1071_v15 }
 0x212   :  { %v1336_v34 = vadd.f32 %v1335_v46, %v1247_v42 }
 0x213   :  { %v1161_v53 = vadd.f32 %v1160_v26, %v1072_v33 }
 0x214   :  { %1393 = vst [vmem:[%s2555_s5 + $0x78] sm:$0xff] %v1336_v34 }
 0x217   :  { %v1249_v56 = vpop.f32.mrf.mxu2  ;;  %v1338_v63 = vpop.f32.mrf.mxu3 }
 0x218   :  { %v1250_v61 = vadd.f32 %v1249_v56, %v1161_v53  ;;  %v1073_v58 = vpop.f32.mrf.mxu0  ;;  %v1162_v22 = vpop.f32.mrf.mxu1 }
 0x219   :  { %v1074_v38 = vadd.f32 %v2379_v40, %v1073_v58 }
 0x21a   :  { %v1339_v4 = vadd.f32 %v1338_v63, %v1250_v61 }
 0x21b   :  { %v1163_v0 = vadd.f32 %v1162_v22, %v1074_v38 }
 0x21c   :  { %1394 = vst [vmem:[%s2555_s5 + $0x80] sm:$0xff] %v1339_v4 }
 0x21f   :  { %v1251_v25 = vpop.f32.mrf.mxu2  ;;  %v1340_v6 = vpop.f32.mrf.mxu3 }
 0x220   :  { %v1252_v44 = vadd.f32 %v1251_v25, %v1163_v0  ;;  %v1076_v23 = vpop.f32.mrf.mxu0  ;;  %v1165_v13 = vpop.f32.mrf.mxu1 }
 0x221   :  { %v1077_v1 = vadd.f32 %v2379_v40, %v1076_v23 }
 0x222   :  { %v1341_v29 = vadd.f32 %v1340_v6, %v1252_v44 }
 0x223   :  { %v1166_v35 = vadd.f32 %v1165_v13, %v1077_v1 }
 0x224   :  { %1395 = vst [vmem:[%s2555_s5 + $0x88] sm:$0xff] %v1341_v29 }
 0x227   :  { %v1254_v3 = vpop.f32.mrf.mxu2  ;;  %v1343_v2 = vpop.f32.mrf.mxu3 }
 0x228   :  { %v1255_v7 = vadd.f32 %v1254_v3, %v1166_v35  ;;  %v1078_v57 = vpop.f32.mrf.mxu0  ;;  %v1167_v9 = vpop.f32.mrf.mxu1 }
 0x229   :  { %v1079_v20 = vadd.f32 %v2379_v40, %v1078_v57 }
 0x22a   :  { %v1344_v14 = vadd.f32 %v1343_v2, %v1255_v7 }
 0x22b   :  { %v1168_v12 = vadd.f32 %v1167_v9, %v1079_v20 }
 0x22c   :  { %1396 = vst [vmem:[%s2555_s5 + $0x90] sm:$0xff] %v1344_v14 }
 0x22f   :  { %v1256_v8 = vpop.f32.mrf.mxu2  ;;  %v1345_v50 = vpop.f32.mrf.mxu3 }
 0x230   :  { %v1257_v19 = vadd.f32 %v1256_v8, %v1168_v12  ;;  %v1081_v37 = vpop.f32.mrf.mxu0  ;;  %v1170_v54 = vpop.f32.mrf.mxu1 }
 0x231   :  { %v1082_v10 = vadd.f32 %v2379_v40, %v1081_v37 }
 0x232   :  { %v1346_v62 = vadd.f32 %v1345_v50, %v1257_v19 }
 0x233   :  { %v1171_v11 = vadd.f32 %v1170_v54, %v1082_v10 }
 0x234   :  { %1397 = vst [vmem:[%s2555_s5 + $0x98] sm:$0xff] %v1346_v62 }
 0x237   :  { %v1259_v21 = vpop.f32.mrf.mxu2  ;;  %v1348_v30 = vpop.f32.mrf.mxu3 }
 0x238   :  { %v1260_v60 = vadd.f32 %v1259_v21, %v1171_v11  ;;  %v1083_v18 = vpop.f32.mrf.mxu0  ;;  %v1172_v24 = vpop.f32.mrf.mxu1 }
 0x239   :  { %v1084_v59 = vadd.f32 %v2379_v40, %v1083_v18 }
 0x23a   :  { %v1349_v36 = vadd.f32 %v1348_v30, %v1260_v60 }
 0x23b   :  { %v1173_v39 = vadd.f32 %v1172_v24, %v1084_v59 }
 0x23c   :  { %1398 = vst [vmem:[%s2555_s5 + $0xa0] sm:$0xff] %v1349_v36 }
 0x23f   :  { %v1261_v55 = vpop.f32.mrf.mxu2  ;;  %v1350_v31 = vpop.f32.mrf.mxu3 }
 0x240   :  { %v1262_v45 = vadd.f32 %v1261_v55, %v1173_v39  ;;  %v1086_v16 = vpop.f32.mrf.mxu0  ;;  %v1175_v27 = vpop.f32.mrf.mxu1 }
 0x241   :  { %v1087_v43 = vadd.f32 %v2379_v40, %v1086_v16 }
 0x242   :  { %v1351_v17 = vadd.f32 %v1350_v31, %v1262_v45 }
 0x243   :  { %v1176_v41 = vadd.f32 %v1175_v27, %v1087_v43 }
 0x244   :  { %1399 = vst [vmem:[%s2555_s5 + $0xa8] sm:$0xff] %v1351_v17 }
 0x247   :  { %v1264_v47 = vpop.f32.mrf.mxu2  ;;  %v1353_v48 = vpop.f32.mrf.mxu3 }
 0x248   :  { %v1265_v49 = vadd.f32 %v1264_v47, %v1176_v41  ;;  %v1088_v52 = vpop.f32.mrf.mxu0  ;;  %v1177_v51 = vpop.f32.mrf.mxu1 }
 0x249   :  { %v1089_v28 = vadd.f32 %v2379_v40, %v1088_v52 }
 0x24a   :  { %v1354_v32 = vadd.f32 %v1353_v48, %v1265_v49 }
 0x24b   :  { %v1178_v5 = vadd.f32 %v1177_v51, %v1089_v28 }
 0x24c   :  { %1400 = vst [vmem:[%s2555_s5 + $0xb0] sm:$0xff] %v1354_v32 }
 0x24f   :  { %v1266_v42 = vpop.f32.mrf.mxu2  ;;  %v1355_v15 = vpop.f32.mrf.mxu3 }
 0x250   :  { %v1267_v46 = vadd.f32 %v1266_v42, %v1178_v5  ;;  %v1091_v26 = vpop.f32.mrf.mxu0  ;;  %v1180_v34 = vpop.f32.mrf.mxu1 }
 0x251   :  { %v1092_v53 = vadd.f32 %v2379_v40, %v1091_v26 }
 0x252   :  { %v1356_v33 = vadd.f32 %v1355_v15, %v1267_v46 }
 0x253   :  { %v1181_v56 = vadd.f32 %v1180_v34, %v1092_v53 }
 0x254   :  { %1401 = vst [vmem:[%s2555_s5 + $0xb8] sm:$0xff] %v1356_v33 }
 0x257   :  { %v1269_v61 = vpop.f32.mrf.mxu2  ;;  %v1358_v58 = vpop.f32.mrf.mxu3 }
 0x258   :  { %v1270_v63 = vadd.f32 %v1269_v61, %v1181_v56  ;;  %v1093_v22 = vpop.f32.mrf.mxu0  ;;  %v1182_v4 = vpop.f32.mrf.mxu1 }
 0x259   :  { %v1094_v0 = vadd.f32 %v2379_v40, %v1093_v22 }
 0x25a   :  { %v1359_v38 = vadd.f32 %v1358_v58, %v1270_v63 }
 0x25b   :  { %v1183_v25 = vadd.f32 %v1182_v4, %v1094_v0 }
 0x25c   :  { %1402 = vst [vmem:[%s2555_s5 + $0xc0] sm:$0xff] %v1359_v38 }
 0x25f   :  { %v1271_v44 = vpop.f32.mrf.mxu2  ;;  %v1360_v23 = vpop.f32.mrf.mxu3 }
 0x260   :  { %v1272_v6 = vadd.f32 %v1271_v44, %v1183_v25  ;;  %v1096_v13 = vpop.f32.mrf.mxu0  ;;  %v1185_v29 = vpop.f32.mrf.mxu1 }
 0x261   :  { %v1097_v35 = vadd.f32 %v2379_v40, %v1096_v13 }
 0x262   :  { %v1361_v1 = vadd.f32 %v1360_v23, %v1272_v6 }
 0x263   :  { %v1186_v3 = vadd.f32 %v1185_v29, %v1097_v35 }
 0x264   :  { %1403 = vst [vmem:[%s2555_s5 + $0xc8] sm:$0xff] %v1361_v1 }
 0x267   :  { %v1274_v7 = vpop.f32.mrf.mxu2  ;;  %v1363_v57 = vpop.f32.mrf.mxu3 }
 0x268   :  { %v1275_v2 = vadd.f32 %v1274_v7, %v1186_v3  ;;  %v1098_v9 = vpop.f32.mrf.mxu0  ;;  %v1187_v14 = vpop.f32.mrf.mxu1 }
 0x269   :  { %v1099_v12 = vadd.f32 %v2379_v40, %v1098_v9 }
 0x26a   :  { %v1364_v20 = vadd.f32 %v1363_v57, %v1275_v2 }
 0x26b   :  { %v1188_v8 = vadd.f32 %v1187_v14, %v1099_v12 }
 0x26c   :  { %1404 = vst [vmem:[%s2555_s5 + $0xd0] sm:$0xff] %v1364_v20 }
 0x26f   :  { %v1276_v19 = vpop.f32.mrf.mxu2  ;;  %v1365_v37 = vpop.f32.mrf.mxu3 }
 0x270   :  { %v1277_v50 = vadd.f32 %v1276_v19, %v1188_v8  ;;  %v1101_v54 = vpop.f32.mrf.mxu0  ;;  %v1190_v62 = vpop.f32.mrf.mxu1 }
 0x271   :  { %v1102_v11 = vadd.f32 %v2379_v40, %v1101_v54 }
 0x272   :  { %v1366_v10 = vadd.f32 %v1365_v37, %v1277_v50 }
 0x273   :  { %v1191_v21 = vadd.f32 %v1190_v62, %v1102_v11 }
 0x274   :  { %1405 = vst [vmem:[%s2555_s5 + $0xd8] sm:$0xff] %v1366_v10 }
 0x277   :  { %v1279_v60 = vpop.f32.mrf.mxu2  ;;  %v1368_v18 = vpop.f32.mrf.mxu3 }
 0x278   :  { %v1280_v30 = vadd.f32 %v1279_v60, %v1191_v21  ;;  %v1103_v24 = vpop.f32.mrf.mxu0  ;;  %v1192_v36 = vpop.f32.mrf.mxu1 }
 0x279   :  { %v1104_v39 = vadd.f32 %v2379_v40, %v1103_v24 }
 0x27a   :  { %v1369_v59 = vadd.f32 %v1368_v18, %v1280_v30 }
 0x27b   :  { %v1193_v55 = vadd.f32 %v1192_v36, %v1104_v39 }
 0x27c   :  { %1406 = vst [vmem:[%s2555_s5 + $0xe0] sm:$0xff] %v1369_v59 }
 0x27f   :  { %v1281_v45 = vpop.f32.mrf.mxu2  ;;  %v1370_v16 = vpop.f32.mrf.mxu3 }
 0x280   :  { %v1282_v31 = vadd.f32 %v1281_v45, %v1193_v55  ;;  %v1106_v27 = vpop.f32.mrf.mxu0  ;;  %v1195_v41 = vpop.f32.mrf.mxu1 }
 0x281   :  { %v1107_v43 = vadd.f32 %v2379_v40, %v1106_v27 }
 0x282   :  { %v1371_v17 = vadd.f32 %v1370_v16, %v1282_v31 }
 0x283   :  { %v1196_v47 = vadd.f32 %v1195_v41, %v1107_v43 }
 0x284   :  { %1407 = vst [vmem:[%s2555_s5 + $0xe8] sm:$0xff] %v1371_v17 }
 0x287   :  { %v1284_v49 = vpop.f32.mrf.mxu2  ;;  %v1373_v52 = vpop.f32.mrf.mxu3 }
 0x288   :  { %v1285_v48 = vadd.f32 %v1284_v49, %v1196_v47  ;;  %v1108_v51 = vpop.f32.mrf.mxu0  ;;  %v1197_v5 = vpop.f32.mrf.mxu1 }
 0x289   :  { %v1109_v28 = vadd.f32 %v2379_v40, %v1108_v51 }
 0x28a   :  { %v1374_v32 = vadd.f32 %v1373_v52, %v1285_v48 }
 0x28b   :  { %v1198_v42 = vadd.f32 %v1197_v5, %v1109_v28 }
 0x28c   :  { %1408 = vst [vmem:[%s2555_s5 + $0xf0] sm:$0xff] %v1374_v32 }
 0x28f   :  { %v1286_v46 = vpop.f32.mrf.mxu2  ;;  %v1375_v26 = vpop.f32.mrf.mxu3 }
 0x290   :  { %v1287_v15 = vadd.f32 %v1286_v46, %v1198_v42 }
 0x292   :  { %v1376_v34 = vadd.f32 %v1375_v26, %v1287_v15 }
 0x294   :  { %1409 = vst [vmem:[%s2555_s5 + $0xf8] sm:$0xff] %v1376_v34 }
 0x295   :  { %1414 = vsyncpa [#allocation3], 1 }

</bundles_post_ra>
